<compile_context>
chip_gen: v7x
topology: tpu7x:2x2x1
jax: 0.10.0
libtpu: 0.0.40
codegen_flags: <defaults>
</compile_context>

<pallas_src>
import functools

import jax
import jax.numpy as jnp
import numpy as np
from jax.experimental import pallas as pl
from jax.experimental.pallas import tpu as pltpu


def _round_up(v, m):
    return ((v + m - 1) // m) * m


def _softplus(x):
    # Matches torch.nn.Softplus(beta=1, threshold=20):
    #   softplus(x) = x               if x > 20
    #               = log(1+exp(x))   otherwise
    safe = jnp.minimum(x, 20.0)
    return jnp.where(x > 20.0, x, jnp.log1p(jnp.exp(safe)))


def _mlp_kernel(x_ref, w_in_ref, b_in_ref, w_h_ref, b_h_ref, w_out_ref,
                b_out_ref, o_ref, *, n_hidden_minus_1):
    compute_dtype = w_in_ref.dtype

    # Input layer: MXU matmul (f32 accumulate) + bias + Softplus (VPU/EUP).
    h = jnp.dot(x_ref[...], w_in_ref[...], preferred_element_type=jnp.float32)
    h = _softplus(h + b_in_ref[...])

    # TODO(synk): dropout_prob is 0.0 in this config -> identity; a nonzero
    # dropout would need pltpu.prng_seed + pltpu.prng_random_bits masking here.

    # Hidden layers (statically unrolled; n_hidden_minus_1 is compile-time).
    # TODO(synk): if (L-1)*layer_dim^2 outgrows VMEM (esp. v7x's 64 MiB),
    # stream w_h per layer (extra grid axis / pltpu.emit_pipeline) instead of
    # holding the whole stack resident.
    for i in range(n_hidden_minus_1):
        h = jnp.dot(h.astype(compute_dtype), w_h_ref[i],
                    preferred_element_type=jnp.float32)
        h = _softplus(h + b_h_ref[i])

    # Output layer (no softmax in forward()); lane-dense f32 store.
    out = jnp.dot(h.astype(compute_dtype), w_out_ref[...],
                  preferred_element_type=jnp.float32)
    o_ref[...] = (out + b_out_ref[...]).astype(o_ref.dtype)


def model_classification_forward(x, params, *, batch_tile=None,
                                 compute_dtype=jnp.bfloat16):
    """MLP forward pass as a single Pallas TPU kernel.

    params (weights pre-transposed to (in, out) so the kernel computes x@W+b):
      w_in  : (input_dim, layer_dim)      b_in  : (1, layer_dim)
      w_h   : (L-1, layer_dim, layer_dim) b_h   : (L-1, 1, layer_dim)
      w_out : (layer_dim, output_dim)     b_out : (1, output_dim)
    """
    x = x.astype(jnp.float32)        # mirrors x.float() in the PyTorch forward
    B, input_dim = x.shape
    layer_dim = params["w_in"].shape[1]
    output_dim = params["w_out"].shape[1]
    n_h = int(params["w_h"].shape[0])

    # ---- lane-dense padding: all minor dims -> multiples of 128 -------------
    p_in = _round_up(input_dim, 128)
    p_hid = _round_up(layer_dim, 128)
    p_out = _round_up(output_dim, 128)

    if batch_tile is None:
        batch_tile = 128 if B >= 256 else _round_up(B, 8)
    tb = batch_tile
    assert tb % 8 == 0, "batch tile must be a multiple of 8 (f32 sublanes)"
    b_pad = _round_up(B, tb)

    x_p = jnp.pad(x, ((0, b_pad - B), (0, p_in - input_dim))).astype(compute_dtype)
    w_in = jnp.pad(params["w_in"],
                   ((0, p_in - input_dim), (0, p_hid - layer_dim))
                   ).astype(compute_dtype)
    b_in = jnp.pad(params["b_in"], ((0, 0), (0, p_hid - layer_dim))
                   ).astype(jnp.float32)
    if n_h > 0:
        w_h = jnp.pad(params["w_h"],
                      ((0, 0), (0, p_hid - layer_dim), (0, p_hid - layer_dim))
                      ).astype(compute_dtype)
        b_h = jnp.pad(params["b_h"], ((0, 0), (0, 0), (0, p_hid - layer_dim))
                      ).astype(jnp.float32)
    else:  # dummy (never read in the kernel); avoids zero-sized operands
        w_h = jnp.zeros((1, p_hid, p_hid), compute_dtype)
        b_h = jnp.zeros((1, 1, p_hid), jnp.float32)
    w_out = jnp.pad(params["w_out"],
                    ((0, p_hid - layer_dim), (0, p_out - output_dim))
                    ).astype(compute_dtype)
    b_out = jnp.pad(params["b_out"], ((0, 0), (0, p_out - output_dim))
                    ).astype(jnp.float32)

    kernel = functools.partial(_mlp_kernel, n_hidden_minus_1=n_h)
    grid = (b_pad // tb,)

    # Weights / biases: untiled, resident once in VMEM (no double-buffering).
    vmem_full = pl.BlockSpec(memory_space=pltpu.MemorySpace.VMEM)

    out_p = pl.pallas_call(
        kernel,
        out_shape=jax.ShapeDtypeStruct((b_pad, p_out), jnp.float32),
        grid_spec=pltpu.PrefetchScalarGridSpec(
            num_scalar_prefetch=0,
            grid=grid,
            in_specs=[
                pl.BlockSpec((tb, p_in), lambda i: (i, 0)),   # x (pipelined)
                vmem_full,                                    # w_in
                vmem_full,                                    # b_in
                vmem_full,                                    # w_h
                vmem_full,                                    # b_h
                vmem_full,                                    # w_out
                vmem_full,                                    # b_out
            ],
            out_specs=pl.BlockSpec((tb, p_out), lambda i: (i, 0)),
        ),
        compiler_params=pltpu.CompilerParams(
            dimension_semantics=("parallel",)),
    )(x_p, w_in, b_in, w_h, b_h, w_out, b_out)

    return out_p[:B, :output_dim]


def init_params(key, input_dim, output_dim, layer_dim, number_hidden_layer):
    """Deterministic synthetic init matching nn.Linear parameter shapes
    (weights pre-transposed to (in, out) for x @ W)."""
    n_h = number_hidden_layer - 1
    keys = jax.random.split(key, 6)
    scale_in = 1.0 / np.sqrt(input_dim)
    scale_h = 1.0 / np.sqrt(layer_dim)
    return {
        "w_in": jax.random.uniform(keys[0], (input_dim, layer_dim), jnp.float32,
                                   -scale_in, scale_in),
        "b_in": jax.random.uniform(keys[1], (1, layer_dim), jnp.float32,
                                   -scale_in, scale_in),
        "w_h": jax.random.uniform(keys[2], (n_h, layer_dim, layer_dim),
                                  jnp.float32, -scale_h, scale_h),
        "b_h": jax.random.uniform(keys[3], (n_h, 1, layer_dim), jnp.float32,
                                  -scale_h, scale_h),
        "w_out": jax.random.uniform(keys[4], (layer_dim, output_dim),
                                    jnp.float32, -scale_h, scale_h),
        "b_out": jax.random.uniform(keys[5], (1, output_dim), jnp.float32,
                                    -scale_h, scale_h),
    }


def reference_forward(x, params):
    """Pure-JAX reference (mirrors the PyTorch forward) for correctness check."""
    hp = jax.lax.Precision.HIGHEST
    h = _softplus(jnp.dot(x.astype(jnp.float32), params["w_in"], precision=hp)
                  + params["b_in"])
    for i in range(params["w_h"].shape[0]):
        h = _softplus(jnp.dot(h, params["w_h"][i], precision=hp)
                      + params["b_h"][i])
    return jnp.dot(h, params["w_out"], precision=hp) + params["b_out"]


if __name__ == "__main__":
    # Small shapes consistent with the module; batch chosen so the grid has
    # 2 steps (pipelining / 2-core sharding exercised).
    batch = 256
    input_dim = 16
    layer_dim = 32
    output_dim = 4
    number_hidden_layer = 3   # -> 2 extra (Linear, Softplus) hidden blocks

    key = jax.random.PRNGKey(0)
    k_x, k_p = jax.random.split(key)
    x = jax.random.normal(k_x, (batch, input_dim), jnp.float32)
    params = init_params(k_p, input_dim, output_dim, layer_dim,
                         number_hidden_layer)

    ref = jax.block_until_ready(reference_forward(x, params))

    # f32-operand run (semantic check; tolerance covers MXU pass variants).
    out_f32 = jax.block_until_ready(
        model_classification_forward(x, params, batch_tile=128,
                                     compute_dtype=jnp.float32))
    assert out_f32.shape == (batch, output_dim)
    np.testing.assert_allclose(np.asarray(out_f32), np.asarray(ref),
                               rtol=1e-2, atol=1e-2)

    # bf16-operand run (fast MXU path on v6e/v7x); looser tolerance.
    out_bf16 = jax.block_until_ready(
        model_classification_forward(x, params, batch_tile=128,
                                     compute_dtype=jnp.bfloat16))
    assert out_bf16.shape == (batch, output_dim)
    np.testing.assert_allclose(np.asarray(out_bf16), np.asarray(ref),
                               rtol=5e-2, atol=5e-2)

    print("KERNEL_OK")
</pallas_src>

<mosaic_0001>
module attributes {stable_mosaic.version = 11 : i64} {
  func.func @_mlp_kernel(%arg0: i32, %arg1: memref<128x128xf32, #tpu.memory_space<vmem>>, %arg2: memref<128x128xf32, #tpu.memory_space<vmem>>, %arg3: memref<1x128xf32, #tpu.memory_space<vmem>>, %arg4: memref<2x128x128xf32, #tpu.memory_space<vmem>>, %arg5: memref<2x1x128xf32, #tpu.memory_space<vmem>>, %arg6: memref<128x128xf32, #tpu.memory_space<vmem>>, %arg7: memref<1x128xf32, #tpu.memory_space<vmem>>, %arg8: memref<128x128xf32, #tpu.memory_space<vmem>>) attributes {dimension_semantics = [#tpu.dimension_semantics<parallel>], iteration_bounds = array<i64: 2>, scalar_prefetch = 0 : i64, scratch_operands = 0 : i64, tpu.core_type = #tpu.core_type<tc>, window_params = [{transform_indices = @transform_0, window_bounds = array<i64: 128, 128>}, {pipeline_mode = #tpu.pipeline_mode<synchronous>, transform_indices = @transform_1, window_bounds = array<i64: 128, 128>}, {pipeline_mode = #tpu.pipeline_mode<synchronous>, transform_indices = @transform_2, window_bounds = array<i64: 1, 128>}, {pipeline_mode = #tpu.pipeline_mode<synchronous>, transform_indices = @transform_3, window_bounds = array<i64: 2, 128, 128>}, {pipeline_mode = #tpu.pipeline_mode<synchronous>, transform_indices = @transform_4, window_bounds = array<i64: 2, 1, 128>}, {pipeline_mode = #tpu.pipeline_mode<synchronous>, transform_indices = @transform_5, window_bounds = array<i64: 128, 128>}, {pipeline_mode = #tpu.pipeline_mode<synchronous>, transform_indices = @transform_6, window_bounds = array<i64: 1, 128>}, {transform_indices = @transform_7, window_bounds = array<i64: 128, 128>}]} {
    %c0 = arith.constant 0 : index
    %c0_0 = arith.constant 0 : index
    %0 = vector.load %arg1[%c0, %c0_0] : memref<128x128xf32, #tpu.memory_space<vmem>>, vector<128x128xf32>
    %c0_1 = arith.constant 0 : index
    %c0_2 = arith.constant 0 : index
    %1 = vector.load %arg2[%c0_1, %c0_2] : memref<128x128xf32, #tpu.memory_space<vmem>>, vector<128x128xf32>
    %cst = arith.constant dense<0.000000e+00> : vector<128x128xf32>
    %2 = tpu.matmul %0, %1, %cst {dimension_numbers = #tpu.dot_dimension_numbers<[1], [0], [0], [1], [0, 0, 1, 1], [], []>} : vector<128x128xf32>, vector<128x128xf32>, vector<128x128xf32> -> vector<128x128xf32>
    %c0_3 = arith.constant 0 : index
    %c0_4 = arith.constant 0 : index
    %3 = vector.load %arg3[%c0_3, %c0_4] : memref<1x128xf32, #tpu.memory_space<vmem>>, vector<1x128xf32>
    %4 = vector.broadcast %3 : vector<1x128xf32> to vector<128x128xf32>
    %5 = arith.addf %2, %4 : vector<128x128xf32>
    %cst_5 = arith.constant 2.000000e+01 : f32
    %6 = vector.broadcast %cst_5 : f32 to vector<128x128xf32>
    %7 = arith.minimumf %5, %6 : vector<128x128xf32>
    %cst_6 = arith.constant 2.000000e+01 : f32
    %8 = vector.broadcast %cst_6 : f32 to vector<128x128xf32>
    %9 = arith.cmpf ogt, %5, %8 : vector<128x128xf32>
    %10 = math.exp %7 : vector<128x128xf32>
    %11 = math.log1p %10 : vector<128x128xf32>
    %12 = arith.select %9, %5, %11 : vector<128x128xi1>, vector<128x128xf32>
    %c0_7 = arith.constant 0 : index
    %c0_8 = arith.constant 0 : index
    %c0_9 = arith.constant 0 : index
    %13 = vector.load %arg4[%c0_7, %c0_8, %c0_9] : memref<2x128x128xf32, #tpu.memory_space<vmem>>, vector<1x128x128xf32>
    %14 = vector.shape_cast %13 : vector<1x128x128xf32> to vector<128x128xf32>
    %cst_10 = arith.constant dense<0.000000e+00> : vector<128x128xf32>
    %15 = tpu.matmul %12, %14, %cst_10 {dimension_numbers = #tpu.dot_dimension_numbers<[1], [0], [0], [1], [0, 0, 1, 1], [], []>} : vector<128x128xf32>, vector<128x128xf32>, vector<128x128xf32> -> vector<128x128xf32>
    %c0_11 = arith.constant 0 : index
    %c0_12 = arith.constant 0 : index
    %c0_13 = arith.constant 0 : index
    %16 = vector.load %arg5[%c0_11, %c0_12, %c0_13] : memref<2x1x128xf32, #tpu.memory_space<vmem>>, vector<1x1x128xf32>
    %17 = vector.shape_cast %16 : vector<1x1x128xf32> to vector<1x128xf32>
    %18 = vector.broadcast %17 : vector<1x128xf32> to vector<128x128xf32>
    %19 = arith.addf %15, %18 : vector<128x128xf32>
    %cst_14 = arith.constant 2.000000e+01 : f32
    %20 = vector.broadcast %cst_14 : f32 to vector<128x128xf32>
    %21 = arith.minimumf %19, %20 : vector<128x128xf32>
    %cst_15 = arith.constant 2.000000e+01 : f32
    %22 = vector.broadcast %cst_15 : f32 to vector<128x128xf32>
    %23 = arith.cmpf ogt, %19, %22 : vector<128x128xf32>
    %24 = math.exp %21 : vector<128x128xf32>
    %25 = math.log1p %24 : vector<128x128xf32>
    %26 = arith.select %23, %19, %25 : vector<128x128xi1>, vector<128x128xf32>
    %c1 = arith.constant 1 : index
    %c0_16 = arith.constant 0 : index
    %c0_17 = arith.constant 0 : index
    %27 = vector.load %arg4[%c1, %c0_16, %c0_17] : memref<2x128x128xf32, #tpu.memory_space<vmem>>, vector<1x128x128xf32>
    %28 = vector.shape_cast %27 : vector<1x128x128xf32> to vector<128x128xf32>
    %cst_18 = arith.constant dense<0.000000e+00> : vector<128x128xf32>
    %29 = tpu.matmul %26, %28, %cst_18 {dimension_numbers = #tpu.dot_dimension_numbers<[1], [0], [0], [1], [0, 0, 1, 1], [], []>} : vector<128x128xf32>, vector<128x128xf32>, vector<128x128xf32> -> vector<128x128xf32>
    %c1_19 = arith.constant 1 : index
    %c0_20 = arith.constant 0 : index
    %c0_21 = arith.constant 0 : index
    %30 = vector.load %arg5[%c1_19, %c0_20, %c0_21] : memref<2x1x128xf32, #tpu.memory_space<vmem>>, vector<1x1x128xf32>
    %31 = vector.shape_cast %30 : vector<1x1x128xf32> to vector<1x128xf32>
    %32 = vector.broadcast %31 : vector<1x128xf32> to vector<128x128xf32>
    %33 = arith.addf %29, %32 : vector<128x128xf32>
    %cst_22 = arith.constant 2.000000e+01 : f32
    %34 = vector.broadcast %cst_22 : f32 to vector<128x128xf32>
    %35 = arith.minimumf %33, %34 : vector<128x128xf32>
    %cst_23 = arith.constant 2.000000e+01 : f32
    %36 = vector.broadcast %cst_23 : f32 to vector<128x128xf32>
    %37 = arith.cmpf ogt, %33, %36 : vector<128x128xf32>
    %38 = math.exp %35 : vector<128x128xf32>
    %39 = math.log1p %38 : vector<128x128xf32>
    %40 = arith.select %37, %33, %39 : vector<128x128xi1>, vector<128x128xf32>
    %c0_24 = arith.constant 0 : index
    %c0_25 = arith.constant 0 : index
    %41 = vector.load %arg6[%c0_24, %c0_25] : memref<128x128xf32, #tpu.memory_space<vmem>>, vector<128x128xf32>
    %cst_26 = arith.constant dense<0.000000e+00> : vector<128x128xf32>
    %42 = tpu.matmul %40, %41, %cst_26 {dimension_numbers = #tpu.dot_dimension_numbers<[1], [0], [0], [1], [0, 0, 1, 1], [], []>} : vector<128x128xf32>, vector<128x128xf32>, vector<128x128xf32> -> vector<128x128xf32>
    %c0_27 = arith.constant 0 : index
    %c0_28 = arith.constant 0 : index
    %43 = vector.load %arg7[%c0_27, %c0_28] : memref<1x128xf32, #tpu.memory_space<vmem>>, vector<1x128xf32>
    %44 = vector.broadcast %43 : vector<1x128xf32> to vector<128x128xf32>
    %45 = arith.addf %42, %44 : vector<128x128xf32>
    %c0_29 = arith.constant 0 : index
    %c0_30 = arith.constant 0 : index
    %46 = vector.load %arg8[%c0_29, %c0_30] : memref<128x128xf32, #tpu.memory_space<vmem>>, vector<128x128xf32>
    tpu.vector_store %arg8[%c0_29, %c0_30], %45 {strides = array<i32>} : memref<128x128xf32, #tpu.memory_space<vmem>>, vector<128x128xf32>,
    return
  }
  func.func @transform_0(%arg0: i32) -> (i32, i32) {
    %c0_i32 = arith.constant 0 : i32
    %c0_i32_0 = arith.constant 0 : i32
    return %arg0, %c0_i32 : i32, i32
  }
  func.func @transform_1(%arg0: i32) -> (i32, i32) {
    %c0_i32 = arith.constant 0 : i32
    %c0_i32_0 = arith.constant 0 : i32
    %c0_i32_1 = arith.constant 0 : i32
    return %c0_i32, %c0_i32_0 : i32, i32
  }
  func.func @transform_2(%arg0: i32) -> (i32, i32) {
    %c0_i32 = arith.constant 0 : i32
    %c0_i32_0 = arith.constant 0 : i32
    %c0_i32_1 = arith.constant 0 : i32
    return %c0_i32, %c0_i32_0 : i32, i32
  }
  func.func @transform_3(%arg0: i32) -> (i32, i32, i32) {
    %c0_i32 = arith.constant 0 : i32
    %c0_i32_0 = arith.constant 0 : i32
    %c0_i32_1 = arith.constant 0 : i32
    %c0_i32_2 = arith.constant 0 : i32
    return %c0_i32, %c0_i32_0, %c0_i32_1 : i32, i32, i32
  }
  func.func @transform_4(%arg0: i32) -> (i32, i32, i32) {
    %c0_i32 = arith.constant 0 : i32
    %c0_i32_0 = arith.constant 0 : i32
    %c0_i32_1 = arith.constant 0 : i32
    %c0_i32_2 = arith.constant 0 : i32
    return %c0_i32, %c0_i32_0, %c0_i32_1 : i32, i32, i32
  }
  func.func @transform_5(%arg0: i32) -> (i32, i32) {
    %c0_i32 = arith.constant 0 : i32
    %c0_i32_0 = arith.constant 0 : i32
    %c0_i32_1 = arith.constant 0 : i32
    return %c0_i32, %c0_i32_0 : i32, i32
  }
  func.func @transform_6(%arg0: i32) -> (i32, i32) {
    %c0_i32 = arith.constant 0 : i32
    %c0_i32_0 = arith.constant 0 : i32
    %c0_i32_1 = arith.constant 0 : i32
    return %c0_i32, %c0_i32_0 : i32, i32
  }
  func.func @transform_7(%arg0: i32) -> (i32, i32) {
    %c0_i32 = arith.constant 0 : i32
    %c0_i32_0 = arith.constant 0 : i32
    return %arg0, %c0_i32 : i32, i32
  }
}

</mosaic_0001>

<bundles_post_ra>
// kernel: tpu_custom_call.1
= control target key start
LH: loop header
LB: loop body
LE: loop exit
PB: predicated region body
PF: predicated region fallthrough
CT: control target
= control target key end

     0   :  { %12 = vsyncpa [#allocation3], 0  ;;  %s3846_s0 = inlined_call_operand.hbm [shape: f32[256,128], index: 0, kind: input, shape index: {}]   ;;  %s3847_s1 = inlined_call_operand.hbm [shape: f32[128,128], index: 1, kind: input, shape index: {}]   ;;  %s3848_s2 = inlined_call_operand.vmem [shape: f32[1,128], index: 2, kind: input, shape index: {}]   ;;  %s3849_s3 = inlined_call_operand.hbm [shape: f32[2,128,128], index: 3, kind: input, shape index: {}]   ;;  %s3850_s4 = inlined_call_operand.vmem [shape: f32[2,1,128], index: 4, kind: input, shape index: {}]   ;;  %s3851_s5 = inlined_call_operand.hbm [shape: f32[128,128], index: 5, kind: input, shape index: {}]   ;;  %s3852_s6 = inlined_call_operand.vmem [shape: f32[1,128], index: 6, kind: input, shape index: {}]   ;;  %s3853_s7 = inlined_call_operand.hbm [shape: f32[256,128], index: 7, kind: output, shape index: {}]  }
   0x1   :  { %14 = vsyncpa [#allocation3 + $0x1], 0 }
   0x2   :  { %15 = vsyncpa [#allocation6], 0 }
   0x3   :  { %16 = vsyncpa [#allocation9], 0 }
   0x4   :  { %17 = vsyncpa [#allocation4], 0 }
   0x5   :  { %19 = vsyncpa [#allocation4 + $0x1], 0  ;;  %s2856_s24 = smov 0   ;;  %s2858_s25 = smov 0  }
   0x6   :  { %s2860_s26 = smov 0   ;;  %s2862_s27 = smov 0  }
   0x7 LB: > { %s2877_s28 = sadd.s32 4294967295, %s2805_s27   ;;  %s1837_s29 = sadd.s32 4294967294, %s2805_s27   ;;  %s2805_s27 = sphi %s2862_s27, %s3907_s27   ;;  %s2801_s26 = sphi %s2860_s26, %s3906_s26   ;;  %s2797_s25 = sphi %s2858_s25, %s3905_s25   ;;  %s2793_s24 = sphi %s2856_s24, %s3904_s24  }
   0x8   : > { %p45_p0 = scmp.ne.s32.totalorder %s2797_s25, %s2793_s24  ;;  %p3854_p1 = scmp.eq.s32.totalorder %s2877_s28, 0 }
   0x9   : > { %p201_p3 = scmp.eq.s32.totalorder %s1837_s29, 1  ;;  %p1838_p5 = scmp.ge.s32.totalorder %s2805_s27, 1 }
   0xa   : > { %p2886_p4 = por %p3854_p1, %p45_p0  ;;  %p208_p7 = scmp.lt.s32.totalorder %s2805_s27, 3 }
   0xb   : > { %p2891_p6 = por %p201_p3, %p45_p0  ;;  %s2807_s10 = smov [#allocation5]  }
   0xc   : > { %s3858_s30 = scalar_select %p2886_p4, 1, 0 }
   0xd   : > { %s3859_s8 = scalar_select %p2891_p6, 1, 0 }
   0xe   : > { %p2896_p8 = pnand %p1838_p5, %p208_p7  ;;  %s220_s11 = sshll.u32 %s2807_s10, 4  ;;  %s2900_s11 = int_to_ptr.vmem [resolvable:$true] %s220_s11 }
   0xf   : > { %3860 = sst [smem:[#allocation15_spill]] %s3859_s8  ;;  %s2808_s13 = smov [#allocation7]  }
  0x10   : > { %s3861_s9 = scalar_select %p2896_p8, 1, 0 }
  0x11   : > { %p2360_p9 = pneg %p2896_p8  ;;  %s236_s14 = sshll.u32 %s2808_s13, 4  ;;  %s2911_s14 = int_to_ptr.vmem [resolvable:$true] %s236_s14 }
  0x12   : > { %s2809_s15 = smov [#allocation8]   ;;  %s2617_s19 = scalar_lea.hbm %s3847_s1, 2048 }
  0x13   : > { %p2907_p11 = pnand %p2360_p9, %p3854_p1  ;;  %s2913_s16 = sshll.u32 %s2809_s15, 4  ;;  %s253_s16 = int_to_ptr.vmem [resolvable:$true] %s2913_s16 }
  0x14   : > { %p2618_p12 = scmp.ne.s32.totalorder %s3847_s1, %s2617_s19  ;;  %p2624_p5 = scmp.lt.u32.totalorder %s2617_s19, %s3847_s1 }
  0x15   : > { %p2923_p13 = pneg %p2907_p11 }
  0x17   : > { %p2620_p0 = pnand %p2923_p13, %p2618_p12 }
  0x19   : > { %p2621_p3 = pneg %p2620_p0 }
  0x1b   : > { %p2626_p7 = pnand %p2624_p5, %p2621_p3 }
  0x1d   : > { %2629 = shalt.err (!%p2626_p7)
}
  0x1e   : > { %s2630_s10 = scalar_lea.vmem %s2900_s11, 2048  ;;  %p2638_p2 = scmp.lt.s32.totalorder %s2900_s11, %s2900_s11 }
  0x1f   : > { %p2631_p9 = scmp.ne.s32.totalorder %s2900_s11, %s2630_s10  ;;  %p2639_p6 = scmp.lt.s32.totalorder %s2630_s10, %s2630_s10 }
  0x21   : > { %p2633_p10 = pnand %p2631_p9, %p2923_p13  ;;  %p2640_p12 = por %p2639_p6, %p2638_p2 }
  0x23   : > { %p2634_p1 = pneg %p2633_p10 }
  0x25   : > { %p2641_p0 = pnand %p2640_p12, %p2634_p1 }
  0x27   : > { %2644 = shalt.err (!%p2641_p0)
}
  0x28   : > { %s2810_s13 = smov 128   ;;  %s2811_s15 = smov 8  }
  0x29   : > { %2363 = dma.hbm_to_vmem [thread:$0]  (!%p2907_p11), %s3847_s1, 2048, %s2900_s11, [#allocation6], %s2810_s13, %s2810_s13, %s2811_s15  }
  0x2a   : > { %s2645_s21 = scalar_lea.hbm %s3849_s3, 4096 }
  0x2b   : > { %p2646_p1 = scmp.ne.s32.totalorder %s3849_s3, %s2645_s21  ;;  %p2652_p10 = scmp.lt.u32.totalorder %s2645_s21, %s3849_s3 }
  0x2d   : > { %p2648_p2 = pnand %p2646_p1, %p2923_p13 }
  0x2f   : > { %p2649_p6 = pneg %p2648_p2 }
  0x31   : > { %p2654_p3 = pnand %p2652_p10, %p2649_p6 }
  0x33   : > { %2657 = shalt.err (!%p2654_p3)
}
  0x34   : > { %s2658_s11 = scalar_lea.vmem %s2911_s14, 4096  ;;  %p2666_p12 = scmp.lt.s32.totalorder %s2911_s14, %s2911_s14 }
  0x35   : > { %p2659_p5 = scmp.ne.s32.totalorder %s2911_s14, %s2658_s11  ;;  %p2667_p0 = scmp.lt.s32.totalorder %s2658_s11, %s2658_s11 }
  0x37   : > { %p2661_p7 = pnand %p2659_p5, %p2923_p13  ;;  %p2668_p1 = por %p2667_p0, %p2666_p12 }
  0x39   : > { %p2662_p9 = pneg %p2661_p7 }
  0x3b   : > { %p2669_p2 = pnand %p2668_p1, %p2662_p9 }
  0x3d   : > { %2672 = shalt.err (!%p2669_p2)
}
  0x3e   : > { %2366 = dma.hbm_to_vmem [thread:$0]  (!%p2907_p11), %s3849_s3, 4096, %s2911_s14, [#allocation6], %s2810_s13, %s2810_s13, %s2811_s15  }
  0x3f   : > { %s2673_s20 = scalar_lea.hbm %s3851_s5, 2048 }
  0x40   : > { %p2674_p6 = scmp.ne.s32.totalorder %s3851_s5, %s2673_s20  ;;  %p2680_p5 = scmp.lt.u32.totalorder %s2673_s20, %s3851_s5 }
  0x42   : > { %p2676_p10 = pnand %p2674_p6, %p2923_p13 }
  0x44   : > { %p2677_p3 = pneg %p2676_p10 }
  0x46   : > { %p2682_p7 = pnand %p2680_p5, %p2677_p3 }
  0x48   : > { %2685 = shalt.err (!%p2682_p7)
}
  0x49   : > { %s2686_s11 = scalar_lea.vmem %s253_s16, 2048  ;;  %p2694_p1 = scmp.lt.s32.totalorder %s253_s16, %s253_s16 }
  0x4a   : > { %p2687_p9 = scmp.ne.s32.totalorder %s253_s16, %s2686_s11  ;;  %p2695_p2 = scmp.lt.s32.totalorder %s2686_s11, %s2686_s11 }
  0x4c   : > { %p2689_p12 = pnand %p2687_p9, %p2923_p13  ;;  %p2696_p4 = por %p2695_p2, %p2694_p1 }
  0x4e   : > { %p2690_p0 = pneg %p2689_p12 }
  0x50   : > { %p2697_p8 = pnand %p2696_p4, %p2690_p0 }
  0x52   : > { %2700 = shalt.err (!%p2697_p8)
}
  0x53   : > { %2369 = dma.hbm_to_vmem [thread:$0]  (!%p2907_p11), %s3851_s5, 2048, %s253_s16, [#allocation9], %s2810_s13, %s2810_s13, %s2811_s15  }
  0x54   : > { %s2996_s22 = sadd.s32 1, %s2805_s27   ;;  %s32_s17 = sadd.s32 1, %s2801_s26 }
  0x55   : > { %s29_s12 = ssub.s32 %s2805_s27, %s2996_s22  ;;  %p39_p8 = scmp.ne.s32.totalorder %s2801_s26, %s2797_s25 }
  0x56   : > { %p30_p4 = scmp.eq.s32.totalorder %s29_s12, 0  ;;  %p40_p13 = scmp.eq.s32.totalorder %s2805_s27, 0 }
  0x57   : > { %p2381_p6 = scmp.lt.s32.totalorder %s2805_s27, 2  ;;  %p3864_p3 = scmp.eq.s32.totalorder %s2877_s28, 1 }
  0x58   : > { %s3006_s18 = scalar_select %p30_p4, %s2801_s26, %s32_s17  }
  0x59   : > { %p41_p10 = por %p40_p13, %p39_p8  ;;  %p3010_p5 = por %p3864_p3, %p39_p8 }
  0x5a   : > { %s269_s20 = sand.u32 1, %s2801_s26   ;;  %s1862_s21 = sshll.u32 %s2805_s27, 11 }
  0x5b   : > { %s1843_s16 = sshll.u32 %s269_s20, 7  ;;  %s3019_s10 = scalar_lea.hbm %s3846_s0, %s1862_s21 }
  0x5c   : > { %s273_s11 = scalar_lea.vmem [#allocation2], %s1843_s16  ;;  %p3021_p11 = pnand %p2381_p6, %p41_p10 }
  0x5d   : > { %s280_s14 = sshll.u32 %s273_s11, 4  ;;  %s3027_s12 = scalar_lea.sflag [#allocation3], %s269_s20  ;;  %s3025_s14 = int_to_ptr.vmem [resolvable:$true] %s280_s14 }
  0x5e   : > { %s2701_s17 = scalar_lea.hbm %s3019_s10, 2048  ;;  %p2703_p9 = pneg %p3021_p11 }
  0x5f   : > { %p2702_p7 = scmp.ne.s32.totalorder %s3019_s10, %s2701_s17  ;;  %s2706_s23 = scalar_lea.hbm %s3846_s0, 4096 }
  0x60   : > { %p2707_p1 = scmp.lt.u32.totalorder %s3019_s10, %s3846_s0  ;;  %p2708_p2 = scmp.lt.u32.totalorder %s2706_s23, %s2701_s17 }
  0x61   : > { %p2704_p12 = pnand %p2703_p9, %p2702_p7  ;;  %p2710_p8 = scmp.lt.u32.totalorder %s2701_s17, %s3019_s10 }
  0x62   : > { %p2709_p4 = por %p2708_p2, %p2707_p1 }
  0x63   : > { %p2705_p0 = pneg %p2704_p12 }
  0x64   : > { %p2711_p13 = por %p2710_p8, %p2709_p4 }
  0x66   : > { %p2712_p6 = pnand %p2711_p13, %p2705_p0 }
  0x68   : > { %2715 = shalt.err (!%p2712_p6)
}
  0x69   : > { %s2716_s20 = scalar_lea.vmem %s3025_s14, 2048  ;;  %s2812_s21 = smov [#allocation2]  }
  0x6a   : > { %p2717_p10 = scmp.ne.s32.totalorder %s3025_s14, %s2716_s20  ;;  %s2721_s16 = sshll.u32 %s2812_s21, 4  ;;  %s2722_s16 = int_to_ptr.vmem [resolvable:$false] %s2721_s16 }
  0x6b   : > { %s2723_s29 = scalar_lea.vmem %s2722_s16, 4096  ;;  %p2724_p12 = scmp.lt.s32.totalorder %s3025_s14, %s2722_s16 }
  0x6c   : > { %p2719_p3 = pnand %p2717_p10, %p2703_p9  ;;  %p2725_p1 = scmp.lt.s32.totalorder %s2723_s29, %s2716_s20 }
  0x6e   : > { %p2720_p7 = pneg %p2719_p3  ;;  %p2726_p2 = por %p2725_p1, %p2724_p12 }
  0x70   : > { %p2727_p4 = pnand %p2726_p2, %p2720_p7 }
  0x72   : > { %2730 = shalt.err (!%p2727_p4)
}
  0x73   : > { %2373 = dma.hbm_to_vmem [thread:$0]  (!%p3021_p11), %s3019_s10, 2048, %s3025_s14, %s3027_s12, %s2810_s13, %s2810_s13, %s2811_s15  }
  0x74   : > { %p3867_p9 = scmp.ne.s32.totalorder %s3861_s9, 0 }
  0x75   : > { %s3061_s17 = sand.u32 (!%p3867_p9), 1, %s2797_s25   ;;  %p3868_p0 = scmp.ne.s32.totalorder (!%p3867_p9), %s3858_s30, 0 }
  0x76   : > { %292 = sbr.rel (%p3867_p9) target bundleno = 1184 (0x4a0), region = 48  ;;  %s1847_s23 = sshll.u32 (!%p3867_p9), %s3061_s17, 7 }
  0x77   : > { %s295_s11 = scalar_lea.sflag (!%p3867_p9), [#allocation3], %s3061_s17  ;;  %s3067_s8 = scalar_lea.vmem (!%p3867_p9), [#allocation2], %s1847_s23 }
  0x7d   : > { %2776 = dma.done.wait (%p3868_p0), %s295_s11, 2048  }
  0x7e   : > { %2778 = vsyncadd (%p3868_p0), %s295_s11, 4294965248  ;;  %p3869_p11 = scmp.eq.s32.totalorder %s2877_s28, 0 }
  0x80   : > { %2780 = dma.done.wait (%p3869_p11), [#allocation6], 6144   ;;  %p3870_p8 = pmov %p3869_p11 }
  0x82   : > { %2782 = vsyncadd (%p3870_p8), [#allocation6], 4294961152  ;;  %p3871_p13 = pmov %p3870_p8 }
  0x83   : > { %p3872_p6 = pmov %p3870_p8 }
  0x84   : > { %2784 = dma.done.wait (%p3871_p13), [#allocation9], 2048  }
  0x85   : > { %2786 = vsyncadd (%p3872_p6), [#allocation9], 4294965248  ;;  %v359_v0 = vld [vmem:[#allocation5] sm:$0xff]  ;;  %v360_v1 = vld [vmem:[#allocation5 + $0x8] sm:$0xff]  ;;  %s3777_s21 = scalar_lea.vmem [#allocation10], %s1847_s23  ;;  %s1863_s16 = sshll.u32 %s2877_s28, 11 }
  0x86   : > { %v361_v2 = vld [vmem:[#allocation5 + $0x10] sm:$0xff]  ;;  %v2216_v3 = vpack.c.bf16 %v360_v1, %v359_v0  ;;  %v362_v4 = vld [vmem:[#allocation5 + $0x18] sm:$0xff]  ;;  %v363_v6 = vld [vmem:[#allocation5 + $0x20] sm:$0xff]  ;;  %s1735_s29 = sshll.u32 %s3777_s21, 4  ;;  %s1722_s28 = scalar_lea.sflag [#allocation4], %s3061_s17  ;;  %s3800_s29 = int_to_ptr.vmem [resolvable:$true] %s1735_s29 }
  0x87   : > { %v2220_v5 = vpack.c.bf16 %v362_v4, %v361_v2  ;;  %v364_v7 = vld [vmem:[#allocation5 + $0x28] sm:$0xff]  ;;  %v343_v9 = vld [vmem:[%s3067_s8] sm:$0xff]  ;;  %v365_v10 = vld [vmem:[#allocation5 + $0x30] sm:$0xff]  ;;  %s2731_s30 = scalar_lea.vmem %s3800_s29, 2048  ;;  %s2813_s9 = smov [#allocation10]  }
  0x88   : > { %2217 = vmatprep.subr.bf16.mxu0 %v2216_v3  ;;  %v2224_v8 = vpack.c.bf16 %v364_v7, %v363_v6  ;;  %v366_v11 = vld [vmem:[#allocation5 + $0x38] sm:$0xff]  ;;  %2024 = vmatprep.mubr.f32.mxu0 %v343_v9  ;;  %v367_v13 = vld [vmem:[#allocation5 + $0x40] sm:$0xff]  ;;  %v368_v14 = vld [vmem:[#allocation5 + $0x48] sm:$0xff]  ;;  %p2732_p10 = scmp.ne.s32.totalorder %s3800_s29, %s2731_s30  ;;  %s2735_s13 = sshll.u32 %s2813_s9, 4  ;;  %s2736_s13 = int_to_ptr.vmem [resolvable:$false] %s2735_s13 }
  0x89   : > { %2219 = vmatpush3.bf16.msra.mxu0 %v2216_v3  ;;  %v2228_v12 = vpack.c.bf16 %v366_v11, %v365_v10  ;;  %v2232_v15 = vpack.c.bf16 %v368_v14, %v367_v13  ;;  %v369_v16 = vld [vmem:[#allocation5 + $0x50] sm:$0xff]  ;;  %v370_v17 = vld [vmem:[#allocation5 + $0x58] sm:$0xff]  ;;  %v371_v19 = vld [vmem:[#allocation5 + $0x60] sm:$0xff]  ;;  %s2737_s15 = scalar_lea.vmem %s2736_s13, 4096  ;;  %p2738_p12 = scmp.lt.s32.totalorder %s3800_s29, %s2736_s13 }
  0x8a   : > { %2221 = vmatprep.subr.bf16.mxu0 %v2220_v5  ;;  %v2236_v18 = vpack.c.bf16 %v370_v17, %v369_v16  ;;  %v372_v20 = vld [vmem:[#allocation5 + $0x68] sm:$0xff]  ;;  %v373_v22 = vld [vmem:[#allocation5 + $0x70] sm:$0xff]  ;;  %v374_v23 = vld [vmem:[#allocation5 + $0x78] sm:$0xff]  ;;  %p2733_p3 = pnand %p2732_p10, %p3010_p5  ;;  %p2739_p1 = scmp.lt.s32.totalorder %s2737_s15, %s2731_s30 }
  0x8b   : > { %v2240_v21 = vpack.c.bf16 %v372_v20, %v371_v19  ;;  %v2244_v24 = vpack.c.bf16 %v374_v23, %v373_v22  ;;  %v344_v25 = vld [vmem:[%s3067_s8 + $0x8] sm:$0xff]  ;;  %v345_v26 = vld [vmem:[%s3067_s8 + $0x10] sm:$0xff]  ;;  %v346_v27 = vld [vmem:[%s3067_s8 + $0x18] sm:$0xff] }
  0x8c   : > { %v347_v28 = vld [vmem:[%s3067_s8 + $0x20] sm:$0xff]  ;;  %v348_v29 = vld [vmem:[%s3067_s8 + $0x28] sm:$0xff]  ;;  %v349_v30 = vld [vmem:[%s3067_s8 + $0x30] sm:$0xff]  ;;  %p2734_p7 = pneg %p2733_p3  ;;  %p2740_p2 = por %p2739_p1, %p2738_p12 }
  0x8d   : > { %2223 = vmatpush3.bf16.msra.mxu0 %v2220_v5  ;;  %v350_v31 = vld [vmem:[%s3067_s8 + $0x38] sm:$0xff]  ;;  %v351_v32 = vld [vmem:[%s3067_s8 + $0x40] sm:$0xff]  ;;  %v352_v33 = vld [vmem:[%s3067_s8 + $0x48] sm:$0xff] }
  0x8e   : > { %2225 = vmatprep.subr.bf16.mxu0 %v2224_v8  ;;  %v353_v34 = vld [vmem:[%s3067_s8 + $0x50] sm:$0xff]  ;;  %v354_v35 = vld [vmem:[%s3067_s8 + $0x58] sm:$0xff]  ;;  %v355_v36 = vld [vmem:[%s3067_s8 + $0x60] sm:$0xff]  ;;  %p2741_p4 = pnand %p2740_p2, %p2734_p7 }
  0x8f   : > { %v356_v37 = vld [vmem:[%s3067_s8 + $0x68] sm:$0xff]  ;;  %v357_v38 = vld [vmem:[%s3067_s8 + $0x70] sm:$0xff]  ;;  %v358_v39 = vld [vmem:[%s3067_s8 + $0x78] sm:$0xff]  ;;  %s3798_s8 = scalar_lea.hbm %s3853_s7, %s1863_s16 }
  0x90   : > { %v751_v40 = vld [vmem:[#allocation7] sm:$0xff]  ;;  %v752_v41 = vld [vmem:[#allocation7 + $0x8] sm:$0xff]  ;;  %v753_v43 = vld [vmem:[#allocation7 + $0x10] sm:$0xff] }
  0x91   : > { %2227 = vmatpush3.bf16.msra.mxu0 %v2224_v8  ;;  %v2248_v42 = vpack.c.bf16 %v752_v41, %v751_v40  ;;  %v754_v44 = vld [vmem:[#allocation7 + $0x18] sm:$0xff]  ;;  %v755_v46 = vld [vmem:[#allocation7 + $0x20] sm:$0xff]  ;;  %v756_v47 = vld [vmem:[#allocation7 + $0x28] sm:$0xff] }
  0x92   : > { %2229 = vmatprep.subr.bf16.mxu0 %v2228_v12  ;;  %v2252_v45 = vpack.c.bf16 %v754_v44, %v753_v43  ;;  %v2256_v48 = vpack.c.bf16 %v756_v47, %v755_v46  ;;  %v757_v49 = vld [vmem:[#allocation7 + $0x30] sm:$0xff]  ;;  %v758_v50 = vld [vmem:[#allocation7 + $0x38] sm:$0xff]  ;;  %v759_v52 = vld [vmem:[#allocation7 + $0x40] sm:$0xff] }
  0x93   : > { %2249 = vmatprep.subr.bf16.mxu1 %v2248_v42  ;;  %v2260_v51 = vpack.c.bf16 %v758_v50, %v757_v49  ;;  %v760_v53 = vld [vmem:[#allocation7 + $0x48] sm:$0xff]  ;;  %v761_v55 = vld [vmem:[#allocation7 + $0x50] sm:$0xff]  ;;  %v762_v56 = vld [vmem:[#allocation7 + $0x58] sm:$0xff] }
  0x94   : > { %2251 = vmatpush3.bf16.msra.mxu1 %v2248_v42  ;;  %v2264_v54 = vpack.c.bf16 %v760_v53, %v759_v52  ;;  %v2268_v57 = vpack.c.bf16 %v762_v56, %v761_v55  ;;  %v763_v58 = vld [vmem:[#allocation7 + $0x60] sm:$0xff]  ;;  %v764_v59 = vld [vmem:[#allocation7 + $0x68] sm:$0xff]  ;;  %v765_v61 = vld [vmem:[#allocation7 + $0x70] sm:$0xff] }
  0x95   : > { %2231 = vmatpush3.bf16.msra.mxu0 %v2228_v12  ;;  %2253 = vmatprep.subr.bf16.mxu1 %v2252_v45  ;;  %v2272_v60 = vpack.c.bf16 %v764_v59, %v763_v58  ;;  %v766_v62 = vld [vmem:[#allocation7 + $0x78] sm:$0xff]  ;;  %v3100_v0 = vld [vmem:[%s3848_s2] ss:$0 sm:$0xff] }
  0x96   : > { %2233 = vmatprep.subr.bf16.mxu0 %v2232_v15  ;;  %v2276_v63 = vpack.c.bf16 %v766_v62, %v765_v61 }
  0x98   : > { %2255 = vmatpush3.bf16.msra.mxu1 %v2252_v45 }
  0x99   : > { %2235 = vmatpush3.bf16.msra.mxu0 %v2232_v15  ;;  %2257 = vmatprep.subr.bf16.mxu1 %v2256_v48 }
  0x9a   : > { %2237 = vmatprep.subr.bf16.mxu0 %v2236_v18 }
  0x9c   : > { %2259 = vmatpush3.bf16.msra.mxu1 %v2256_v48 }
  0x9d   : > { %2239 = vmatpush3.bf16.msra.mxu0 %v2236_v18  ;;  %2261 = vmatprep.subr.bf16.mxu1 %v2260_v51 }
  0x9e   : > { %2241 = vmatprep.subr.bf16.mxu0 %v2240_v21 }
  0xa0   : > { %2263 = vmatpush3.bf16.msra.mxu1 %v2260_v51 }
  0xa1   : > { %2243 = vmatpush3.bf16.msra.mxu0 %v2240_v21  ;;  %2265 = vmatprep.subr.bf16.mxu1 %v2264_v54 }
  0xa2   : > { %2245 = vmatprep.subr.bf16.mxu0 %v2244_v24 }
  0xa4   : > { %2267 = vmatpush3.bf16.msra.mxu1 %v2264_v54 }
  0xa5   : > { %2247 = vmatpush3.bf16.msra.mxu0 %v2244_v24  ;;  %2269 = vmatprep.subr.bf16.mxu1 %v2268_v57 }
  0xa8   : > { %2025 = vmatmul.mubr.f32.vlgmr.msra.gmra.mrb[0].mxu0 %v344_v25  ;;  %2271 = vmatpush3.bf16.msra.mxu1 %v2268_v57 }
  0xa9   : > { %2027 = vmatprep.mubr.f32.mxu0 %v345_v26  ;;  %2273 = vmatprep.subr.bf16.mxu1 %v2272_v60 }
  0xac   : > { %2028 = vmatmul.mubr.f32.gmra.mrb[2].mxu0 %v346_v27  ;;  %2275 = vmatpush3.bf16.msra.mxu1 %v2272_v60 }
  0xad   : > { %2030 = vmatprep.mubr.f32.mxu0 %v347_v28  ;;  %2277 = vmatprep.subr.bf16.mxu1 %v2276_v63 }
  0xb0   : > { %2031 = vmatmul.mubr.f32.gmra.mrb[4].mxu0 %v348_v29  ;;  %2279 = vmatpush3.bf16.msra.mxu1 %v2276_v63 }
  0xb1   : > { %2033 = vmatprep.mubr.f32.mxu0 %v349_v30 }
  0xb4   : > { %2034 = vmatmul.mubr.f32.gmra.mrb[6].mxu0 %v350_v31 }
  0xb5   : > { %2036 = vmatprep.mubr.f32.mxu0 %v351_v32 }
  0xb8   : > { %2037 = vmatmul.mubr.f32.gmra.mrb[8].mxu0 %v352_v33 }
  0xb9   : > { %2039 = vmatprep.mubr.f32.mxu0 %v353_v34 }
  0xbc   : > { %2040 = vmatmul.mubr.f32.gmra.mrb[10].mxu0 %v354_v35 }
  0xbd   : > { %2042 = vmatprep.mubr.f32.mxu0 %v355_v36 }
  0xc0   : > { %2043 = vmatmul.mubr.f32.gmra.mrb[12].mxu0 %v356_v37 }
  0xc1   : > { %2045 = vmatprep.mubr.f32.mxu0 %v357_v38 }
  0xc4   : > { %2046 = vmatmul.mubr.f32.gmra.mrb[14].mxu0 %v358_v39 }
 0x17b   : > { %v2026_v1 = vpop.f32.mrb[0].mxu0 }
 0x17c   : > { %v3103_v2 = vadd.f32 %v2026_v1, %v3100_v0  ;;  %v448_v3 = vpop.f32.mrb[1].mxu0 }
 0x17d   : > { %v3106_v4 = vadd.f32 %v3100_v0, %v448_v3 }
 0x17e   : > { %v528_v5 = vmin.f32 %v3103_v2, 20.0  ;;  %vm544_vm0 = vcmp.gt.f32.partialorder %v3103_v2, 20.0 }
 0x17f   : > { %v527_v6 = vmin.f32 %v3106_v4, 20.0  ;;  %v2029_v7 = vpop.f32.mrb[2].mxu0  ;;  %vm543_vm1 = vcmp.gt.f32.partialorder %v3106_v4, 20.0 }
 0x180   : > { %v561_v8 = vmul.f32 1.442695, %v528_v5  ;;  %v3111_v9 = vadd.f32 %v2029_v7, %v3100_v0  ;;  %v458_v10 = vpop.f32.mrb[3].mxu0 }
 0x181   : > { %v559_v11 = vmul.f32 1.442695, %v527_v6  ;;  %v3114_v12 = vadd.f32 %v3100_v0, %v458_v10 }
 0x182   : > { %2425 = vpow2.f32 %v561_v8  ;;  %v530_v13 = vmin.f32 %v3111_v9, 20.0  ;;  %vm546_vm5 = vcmp.gt.f32.partialorder %v3111_v9, 20.0 }
 0x183   : > { %2427 = vpow2.f32 %v559_v11  ;;  %v529_v14 = vmin.f32 %v3114_v12, 20.0  ;;  %v2032_v15 = vpop.f32.mrb[4].mxu0  ;;  %vm545_vm4 = vcmp.gt.f32.partialorder %v3114_v12, 20.0 }
 0x184   : > { %v3119_v16 = vadd.f32 %v2032_v15, %v3100_v0  ;;  %v468_v17 = vpop.f32.mrb[5].mxu0  ;;  %v565_v20 = vmul.f32 1.442695, %v530_v13 }
 0x185   : > { %v563_v18 = vmul.f32 1.442695, %v529_v14  ;;  %v3122_v19 = vadd.f32 %v3100_v0, %v468_v17 }
 0x186   : > { %v532_v21 = vmin.f32 %v3119_v16, 20.0  ;;  %vm548_vm9 = vcmp.gt.f32.partialorder %v3119_v16, 20.0 }
 0x187   : > { %2429 = vpow2.f32 %v563_v18  ;;  %v531_v22 = vmin.f32 %v3122_v19, 20.0  ;;  %v2035_v23 = vpop.f32.mrb[6].mxu0  ;;  %vm547_vm7 = vcmp.gt.f32.partialorder %v3122_v19, 20.0 }
 0x188   : > { %v3127_v24 = vadd.f32 %v2035_v23, %v3100_v0  ;;  %v478_v25 = vpop.f32.mrb[7].mxu0  ;;  %2431 = vpow2.f32 %v565_v20  ;;  %v569_v28 = vmul.f32 1.442695, %v532_v21 }
 0x189   : > { %v567_v26 = vmul.f32 1.442695, %v531_v22  ;;  %v3130_v27 = vadd.f32 %v3100_v0, %v478_v25 }
 0x18a   : > { %v534_v29 = vmin.f32 %v3127_v24, 20.0  ;;  %vm550_vm12 = vcmp.gt.f32.partialorder %v3127_v24, 20.0 }
 0x18b   : > { %v2038_v30 = vpop.f32.mrb[8].mxu0  ;;  %v533_v32 = vmin.f32 %v3130_v27, 20.0  ;;  %2433 = vpow2.f32 %v567_v26  ;;  %vm549_vm11 = vcmp.gt.f32.partialorder %v3130_v27, 20.0 }
 0x18c   : > { %v2426_v31 = vpop.eup %2425  ;;  %v3135_v33 = vadd.f32 %v2038_v30, %v3100_v0  ;;  %v488_v34 = vpop.f32.mrb[9].mxu0  ;;  %2435 = vpow2.f32 %v569_v28  ;;  %v573_v39 = vmul.f32 1.442695, %v534_v29 }
 0x18d   : > { %v2428_v35 = vpop.eup %2427  ;;  %v3138_v36 = vadd.f32 %v3100_v0, %v488_v34  ;;  %v600_v37 = vadd.f32 1.0, %v2426_v31  ;;  %v571_v42 = vmul.f32 1.442695, %v533_v32  ;;  %v603_v49 = vmul.f32 -0.5, %v2426_v31 }
 0x18e   : > { %v591_v38 = vadd.f32 1.0, %v2428_v35  ;;  %v536_v40 = vmin.f32 %v3135_v33, 20.0  ;;  %v594_v48 = vmul.f32 -0.5, %v2428_v35  ;;  %v597_v57 = vand.u32 2147483647, %v2428_v35 }
 0x18f   : > { %v2041_v41 = vpop.f32.mrb[10].mxu0  ;;  %v535_v43 = vmin.f32 %v3138_v36, 20.0  ;;  %v604_v61 = vadd.f32 1.0, %v603_v49  ;;  %v606_v62 = vand.u32 2147483647, %v2426_v31 }
 0x190   : > { %v498_v44 = vpop.f32.mrb[11].mxu0  ;;  %2437 = vlog2.f32 %v591_v38  ;;  %v3145_v46 = vadd.f32 %v2041_v41, %v3100_v0  ;;  %v577_v50 = vmul.f32 1.442695, %v536_v40  ;;  %v595_v60 = vadd.f32 1.0, %v594_v48 }
 0x191   : > { %v3142_v45 = vpop.eup %2429  ;;  %v3148_v47 = vadd.f32 %v3100_v0, %v498_v44  ;;  %2439 = vlog2.f32 %v600_v37  ;;  %v575_v55 = vmul.f32 1.442695, %v535_v43  ;;  %vm3166_vm2 = vcmp.lt.f32.partialorder %v597_v57, 0.0004427343 }
 0x192   : > { %2441 = vpow2.f32 %v573_v39  ;;  %v609_v53 = vadd.f32 1.0, %v3142_v45  ;;  %v3152_v54 = vpop.eup %2431  ;;  %v538_v58 = vmin.f32 %v3145_v46, 20.0  ;;  %v612_v10 = vmul.f32 -0.5, %v3142_v45 }
 0x193   : > { %v537_v51 = vmin.f32 %v3148_v47, 20.0  ;;  %v2044_v52 = vpop.f32.mrb[12].mxu0  ;;  %2443 = vpow2.f32 %v571_v42  ;;  %v618_v6 = vadd.f32 1.0, %v3152_v54  ;;  %v596_v15 = vmul.f32 %v2428_v35, %v595_v60 }
 0x194   : > { %v508_v56 = vpop.f32.mrb[13].mxu0  ;;  %2445 = vlog2.f32 %v609_v53  ;;  %v3162_v3 = vadd.f32 %v2044_v52, %v3100_v0  ;;  %v581_v13 = vmul.f32 1.442695, %v538_v58  ;;  %v605_v18 = vmul.f32 %v2426_v31, %v604_v61 }
 0x195   : > { %v3156_v59 = vadd.f32 %v3100_v0, %v508_v56  ;;  %v3159_v63 = vpop.eup %2433  ;;  %2447 = vpow2.f32 %v577_v50  ;;  %v579_v1 = vmul.f32 1.442695, %v537_v51  ;;  %vm3174_vm3 = vcmp.lt.f32.partialorder %v606_v62, 0.0004427343 }
 0x196   : > { %2449 = vpow2.f32 %v575_v55  ;;  %v3171_v11 = vpop.eup %2435  ;;  %v615_v21 = vand.u32 2147483647, %v3142_v45  ;;  %v627_v22 = vadd.f32 1.0, %v3159_v63  ;;  %v540_v25 = vmin.f32 %v3162_v3, 20.0 }
 0x197   : > { %v2047_v5 = vpop.f32.mrb[14].mxu0  ;;  %v539_v14 = vmin.f32 %v3156_v59, 20.0  ;;  %2451 = vlog2.f32 %v618_v6  ;;  %v621_v28 = vmul.f32 -0.5, %v3152_v54  ;;  %v613_v31 = vadd.f32 1.0, %v612_v10 }
 0x198   : > { %v518_v7 = vpop.f32.mrb[15].mxu0  ;;  %2453 = vpow2.f32 %v579_v1  ;;  %v3184_v29 = vadd.f32 %v2047_v5, %v3100_v0  ;;  %v636_v38 = vadd.f32 1.0, %v3171_v11  ;;  %v585_v43 = vmul.f32 1.442695, %v540_v25 }
 0x199   : > { %2455 = vlog2.f32 %v627_v22  ;;  %v583_v34 = vmul.f32 1.442695, %v539_v14  ;;  %v3189_v35 = vadd.f32 %v3100_v0, %v518_v7  ;;  %v630_v0 = vmul.f32 -0.5, %v3159_v63 }
 0x19a   : > { %v2438_v17 = vpop.eup %2437  ;;  %2457 = vpow2.f32 %v581_v13  ;;  %vm3206_vm6 = vcmp.lt.f32.partialorder %v615_v21, 0.0004427343  ;;  %v622_v49 = vadd.f32 1.0, %v621_v28  ;;  %v614_v51 = vmul.f32 %v3142_v45, %v613_v31 }
 0x19b   : > { %v2440_v23 = vpop.eup %2439  ;;  %v593_v26 = vmul.f32 0.6931472, %v2438_v17  ;;  %2459 = vlog2.f32 %v636_v38  ;;  %v541_v53 = vmin.f32 %v3189_v35, 20.0  ;;  %v624_v55 = vand.u32 2147483647, %v3152_v54 }
 0x19c   : > { %v602_v30 = vmul.f32 0.6931472, %v2440_v23  ;;  %v3186_v32 = vpop.eup %2441  ;;  %2461 = vpow2.f32 %v583_v34  ;;  %v631_v58 = vadd.f32 1.0, %v630_v0  ;;  %v639_v60 = vmul.f32 -0.5, %v3171_v11 }
 0x19d   : > { %v599_v37 = vsel %vm3166_vm2, %v596_v15, %v593_v26  ;;  %v3194_v39 = vpop.eup %2443  ;;  %v654_v45 = vadd.f32 1.0, %v3186_v32  ;;  %v623_v1 = vmul.f32 %v3152_v54, %v622_v49  ;;  %v633_v7 = vand.u32 2147483647, %v3159_v63 }
 0x19e   : > { %v735_v40 = vsel %vm543_vm1, %v3106_v4, %v599_v37  ;;  %v608_v41 = vsel %vm3174_vm3, %v605_v18, %v602_v30  ;;  %v2446_v42 = vpop.eup %2445  ;;  %v542_v4 = vmin.f32 %v3184_v29, 20.0  ;;  %v587_v10 = vmul.f32 1.442695, %v541_v53 }
 0x19f   : > { %2080 = vmatprep.mubr.f32.mxu1 %v735_v40  ;;  %v736_v44 = vsel %vm544_vm0, %v3103_v2, %v608_v41  ;;  %v611_v50 = vmul.f32 0.6931472, %v2446_v42  ;;  %v3212_v52 = vpop.eup %2447  ;;  %v645_v2 = vadd.f32 1.0, %v3194_v39  ;;  %vm625_vm8 = vcmp.lt.f32.partialorder %v624_v55, 0.0004427343 }
 0x1a0   : > { %2081 = vmatmul.mubr.f32.vlgmr.msra.gmra.mrb[0].mxu1 %v736_v44  ;;  %v3217_v56 = vpop.eup %2449  ;;  %v589_v5 = vmul.f32 1.442695, %v542_v4  ;;  %v648_v13 = vmul.f32 -0.5, %v3194_v39  ;;  %v632_v15 = vmul.f32 %v3159_v63, %v631_v58  ;;  %v640_v17 = vadd.f32 1.0, %v639_v60 }
 0x1a1   : > { %v617_v57 = vsel %vm3206_vm6, %v614_v51, %v611_v50  ;;  %v2452_v61 = vpop.eup %2451  ;;  %2463 = vlog2.f32 %v645_v2  ;;  %v657_v21 = vmul.f32 -0.5, %v3186_v32  ;;  %vm634_vm10 = vcmp.lt.f32.partialorder %v633_v7, 0.0004427343 }
 0x1a2   : > { %v737_v62 = vsel %vm545_vm4, %v3114_v12, %v617_v57  ;;  %v620_v6 = vmul.f32 0.6931472, %v2452_v61  ;;  %2465 = vlog2.f32 %v654_v45  ;;  %v3229_v8 = vpop.eup %2453  ;;  %v663_v12 = vadd.f32 1.0, %v3217_v56 }
 0x1a3   : > { %2083 = vmatprep.mubr.f32.mxu1 %v737_v62  ;;  %v2456_v54 = vpop.eup %2455  ;;  %2467 = vpow2.f32 %v585_v43  ;;  %v642_v23 = vand.u32 2147483647, %v3171_v11  ;;  %v672_v63 = vadd.f32 1.0, %v3212_v52  ;;  %v649_v26 = vadd.f32 1.0, %v648_v13 }
 0x1a4   : > { %v626_v14 = vsel %vm625_vm8, %v623_v1, %v620_v6  ;;  %v629_v20 = vmul.f32 0.6931472, %v2456_v54  ;;  %2469 = vlog2.f32 %v663_v12  ;;  %v3239_v22 = vpop.eup %2457  ;;  %v666_v31 = vmul.f32 -0.5, %v3217_v56 }
 0x1a5   : > { %v738_v18 = vsel %vm546_vm5, %v3111_v9, %v626_v14  ;;  %2471 = vpow2.f32 %v589_v5  ;;  %v651_v9 = vand.u32 2147483647, %v3194_v39  ;;  %v2460_v28 = vpop.eup %2459  ;;  %v681_v34 = vadd.f32 1.0, %v3229_v8 }
 0x1a6   : > { %2084 = vmatmul.mubr.f32.gmra.mrb[2].mxu1 %v738_v18  ;;  %2473 = vpow2.f32 %v587_v10  ;;  %v635_v25 = vsel %vm634_vm10, %v632_v15, %v629_v20  ;;  %v3251_v37 = vpop.eup %2461  ;;  %v638_v38 = vmul.f32 0.6931472, %v2460_v28  ;;  %v641_v40 = vmul.f32 %v3171_v11, %v640_v17 }
 0x1a7   : > { %v739_v30 = vsel %vm547_vm7, %v3122_v19, %v635_v25  ;;  %2475 = vlog2.f32 %v672_v63  ;;  %v658_v41 = vadd.f32 1.0, %v657_v21  ;;  %v660_v0 = vand.u32 2147483647, %v3186_v32 }
 0x1a8   : > { %2086 = vmatprep.mubr.f32.mxu1 %v739_v30  ;;  %vm643_vm13 = vcmp.lt.f32.partialorder %v642_v23, 0.0004427343  ;;  %v675_v42 = vmul.f32 -0.5, %v3212_v52  ;;  %2477 = vlog2.f32 %v681_v34  ;;  %v690_v19 = vadd.f32 1.0, %v3239_v22 }
 0x1a9   : > { %v644_v44 = vsel %vm643_vm13, %v641_v40, %v638_v38  ;;  %v650_v48 = vmul.f32 %v3194_v39, %v649_v26  ;;  %vm3258_vm14 = vcmp.lt.f32.partialorder %v651_v9, 0.0004427343  ;;  %v669_v4 = vand.u32 2147483647, %v3217_v56 }
 0x1aa   : > { %v740_v50 = vsel %vm548_vm9, %v3119_v16, %v644_v44  ;;  %v667_v53 = vadd.f32 1.0, %v666_v31  ;;  %2479 = vlog2.f32 %v690_v19  ;;  %v659_v2 = vmul.f32 %v3186_v32, %v658_v41 }
 0x1ab   : > { %v2464_v43 = vpop.eup %2463  ;;  %2087 = vmatmul.mubr.f32.gmra.mrb[4].mxu1 %v740_v50  ;;  %vm661_vm15 = vcmp.lt.f32.partialorder %v660_v0, 0.0004427343  ;;  %v684_v39 = vmul.f32 -0.5, %v3229_v8  ;;  %v676_v60 = vadd.f32 1.0, %v675_v42  ;;  %v693_v45 = vmul.f32 -0.5, %v3239_v22 }
 0x1ac   : > { %v2466_v11 = vpop.eup %2465  ;;  %v647_v51 = vmul.f32 0.6931472, %v2464_v43  ;;  %v699_v16 = vadd.f32 1.0, %v3251_v37  ;;  %vm551_vm0 = vcmp.gt.f32.partialorder %v3138_v36, 20.0  ;;  %v678_v32 = vand.u32 2147483647, %v3212_v52 }
 0x1ad   : > { %v656_v55 = vmul.f32 0.6931472, %v2466_v11  ;;  %v3268_v57 = vpop.eup %2467  ;;  %v668_v10 = vmul.f32 %v3217_v56, %v667_v53  ;;  %vm670_vm1 = vcmp.lt.f32.partialorder %v669_v4, 0.0004427343  ;;  %v687_v12 = vand.u32 2147483647, %v3229_v8 }
 0x1ae   : > { %v653_v58 = vsel %vm3258_vm14, %v650_v48, %v647_v51  ;;  %v2470_v61 = vpop.eup %2469  ;;  %2481 = vlog2.f32 %v699_v16  ;;  %v708_v54 = vadd.f32 1.0, %v3268_v57  ;;  %vm552_vm2 = vcmp.gt.f32.partialorder %v3135_v33, 20.0 }
 0x1af   : > { %v741_v62 = vsel %vm549_vm11, %v3130_v27, %v653_v58  ;;  %v662_v1 = vsel %vm661_vm15, %v659_v2, %v656_v55  ;;  %v3279_v5 = vpop.eup %2471  ;;  %v665_v7 = vmul.f32 0.6931472, %v2470_v61  ;;  %v685_v27 = vadd.f32 1.0, %v684_v39 }
 0x1b0   : > { %2089 = vmatprep.mubr.f32.mxu1 %v741_v62  ;;  %v742_v6 = vsel %vm550_vm12, %v3127_v24, %v662_v1  ;;  %v3285_v13 = vpop.eup %2473  ;;  %v677_v17 = vmul.f32 %v3212_v52, %v676_v60  ;;  %v694_v24 = vadd.f32 1.0, %v693_v45  ;;  %v702_v20 = vmul.f32 -0.5, %v3251_v37 }
 0x1b1   : > { %2090 = vmatmul.mubr.f32.gmra.mrb[6].mxu1 %v742_v6  ;;  %v2476_v14 = vpop.eup %2475  ;;  %v671_v15 = vsel %vm670_vm1, %v668_v10, %v665_v7  ;;  %2483 = vlog2.f32 %v708_v54  ;;  %vm679_vm3 = vcmp.lt.f32.partialorder %v678_v32, 0.0004427343  ;;  %vm553_vm4 = vcmp.gt.f32.partialorder %v3148_v47, 20.0  ;;  %v1144_v32 = vld [vmem:[#allocation7 + $0x80] sm:$0xff]  ;;  %v1145_v6 = vld [vmem:[#allocation7 + $0x88] sm:$0xff]  ;;  %v1146_v10 = vld [vmem:[#allocation7 + $0x90] sm:$0xff] }
 0x1b2   : > { %v743_v56 = vsel %vm551_vm0, %v3138_v36, %v671_v15  ;;  %v674_v18 = vmul.f32 0.6931472, %v2476_v14  ;;  %v2478_v21 = vpop.eup %2477  ;;  %v696_v23 = vand.u32 2147483647, %v3239_v22  ;;  %v717_v63 = vadd.f32 1.0, %v3285_v13  ;;  %v1151_v14 = vld [vmem:[#allocation7 + $0xb8] sm:$0xff] }
 0x1b3   : > { %2092 = vmatprep.mubr.f32.mxu1 %v743_v56  ;;  %v683_v52 = vmul.f32 0.6931472, %v2478_v21  ;;  %v686_v26 = vmul.f32 %v3229_v8, %v685_v27  ;;  %vm688_vm5 = vcmp.lt.f32.partialorder %v687_v12, 0.0004427343  ;;  %v695_v28 = vmul.f32 %v3239_v22, %v694_v24  ;;  %v1148_v27 = vld [vmem:[#allocation7 + $0xa0] sm:$0xff]  ;;  %v1149_v12 = vld [vmem:[#allocation7 + $0xa8] sm:$0xff] }
 0x1b4   : > { %v680_v25 = vsel %vm679_vm3, %v677_v17, %v674_v18  ;;  %v2480_v9 = vpop.eup %2479  ;;  %v711_v30 = vmul.f32 -0.5, %v3268_v57  ;;  %2485 = vlog2.f32 %v717_v63  ;;  %v703_v38 = vadd.f32 1.0, %v702_v20  ;;  %v1152_v17 = vld [vmem:[#allocation7 + $0xc0] sm:$0xff]  ;;  %v1154_v56 = vld [vmem:[#allocation7 + $0xd0] sm:$0xff]  ;;  %v1155_v18 = vld [vmem:[#allocation7 + $0xd8] sm:$0xff] }
 0x1b5   : > { %v744_v36 = vsel %vm552_vm2, %v3135_v33, %v680_v25  ;;  %v689_v31 = vsel %vm688_vm5, %v686_v26, %v683_v52  ;;  %v692_v34 = vmul.f32 0.6931472, %v2480_v9  ;;  %v726_v40 = vadd.f32 1.0, %v3279_v5  ;;  %v1156_v21 = vld [vmem:[#allocation7 + $0xe0] sm:$0xff]  ;;  %v1158_v25 = vld [vmem:[#allocation7 + $0xf0] sm:$0xff]  ;;  %v1159_v52 = vld [vmem:[#allocation7 + $0xf8] sm:$0xff] }
 0x1b6   : > { %2093 = vmatmul.mubr.f32.gmra.mrb[8].mxu1 %v744_v36  ;;  %v745_v8 = vsel %vm553_vm4, %v3148_v47, %v689_v31  ;;  %vm697_vm6 = vcmp.lt.f32.partialorder %v696_v23, 0.0004427343  ;;  %v705_v41 = vand.u32 2147483647, %v3251_v37  ;;  %vm554_vm7 = vcmp.gt.f32.partialorder %v3145_v46, 20.0  ;;  %v1157_v23 = vld [vmem:[#allocation7 + $0xe8] sm:$0xff] }
 0x1b7   : > { %2095 = vmatprep.mubr.f32.mxu1 %v745_v8  ;;  %v698_v33 = vsel %vm697_vm6, %v695_v28, %v692_v34  ;;  %v720_v22 = vmul.f32 -0.5, %v3285_v13  ;;  %2487 = vlog2.f32 %v726_v40  ;;  %v712_v19 = vadd.f32 1.0, %v711_v30  ;;  %v3331_v9 = vld [vmem:[%s3850_s4] ss:$0 sm:$0xff] }
 0x1b8   : > { %v2482_v0 = vpop.eup %2481  ;;  %v746_v42 = vsel %vm554_vm7, %v3145_v46, %v698_v33  ;;  %v704_v44 = vmul.f32 %v3251_v37, %v703_v38  ;;  %v714_v47 = vand.u32 2147483647, %v3268_v57  ;;  %vm706_vm8 = vcmp.lt.f32.partialorder %v705_v41, 0.0004427343 }
 0x1b9   : > { %v701_v43 = vmul.f32 0.6931472, %v2482_v0  ;;  %v729_v48 = vmul.f32 -0.5, %v3279_v5  ;;  %vm555_vm9 = vcmp.gt.f32.partialorder %v3156_v59, 20.0  ;;  %v721_v11 = vadd.f32 1.0, %v720_v22 }
 0x1ba   : > { %2096 = vmatmul.mubr.f32.gmra.mrb[10].mxu1 %v746_v42  ;;  %v713_v46 = vmul.f32 %v3268_v57, %v712_v19  ;;  %v723_v53 = vand.u32 2147483647, %v3285_v13  ;;  %vm715_vm10 = vcmp.lt.f32.partialorder %v714_v47, 0.0004427343  ;;  %vm556_vm11 = vcmp.gt.f32.partialorder %v3162_v3, 20.0 }
 0x1bb   : > { %v2484_v49 = vpop.eup %2483  ;;  %v707_v4 = vsel %vm706_vm8, %v704_v44, %v701_v43  ;;  %v730_v2 = vadd.f32 1.0, %v729_v48  ;;  %v722_v60 = vmul.f32 %v3285_v13, %v721_v11  ;;  %v732_v45 = vand.u32 2147483647, %v3279_v5  ;;  %v1147_v13 = vld [vmem:[#allocation7 + $0x98] sm:$0xff] }
 0x1bc   : > { %v747_v50 = vsel %vm555_vm9, %v3156_v59, %v707_v4  ;;  %v710_v51 = vmul.f32 0.6931472, %v2484_v49  ;;  %vm724_vm12 = vcmp.lt.f32.partialorder %v723_v53, 0.0004427343  ;;  %vm557_vm13 = vcmp.gt.f32.partialorder %v3189_v35, 20.0 }
 0x1bd   : > { %2098 = vmatprep.mubr.f32.mxu1 %v747_v50  ;;  %v731_v62 = vmul.f32 %v3279_v5, %v730_v2  ;;  %vm733_vm14 = vcmp.lt.f32.partialorder %v732_v45, 0.0004427343  ;;  %vm558_vm15 = vcmp.gt.f32.partialorder %v3184_v29, 20.0  ;;  %v2280_v7 = vpack.c.bf16 %v1145_v6, %v1144_v32  ;;  %v1150_v5 = vld [vmem:[#allocation7 + $0xb0] sm:$0xff] }
 0x1be   : > { %v2486_v37 = vpop.eup %2485  ;;  %v716_v55 = vsel %vm715_vm10, %v713_v46, %v710_v51  ;;  %v2288_v54 = vpack.c.bf16 %v1149_v12, %v1148_v27  ;;  %v2292_v15 = vpack.c.bf16 %v1151_v14, %v1150_v5  ;;  %v2300_v20 = vpack.c.bf16 %v1155_v18, %v1154_v56 }
 0x1bf   : > { %v748_v39 = vsel %vm556_vm11, %v3162_v3, %v716_v55  ;;  %v719_v58 = vmul.f32 0.6931472, %v2486_v37  ;;  %2281 = vmatprep.subr.bf16.mxu0 %v2280_v7  ;;  %v2304_v63 = vpack.c.bf16 %v1157_v23, %v1156_v21  ;;  %v2308_v26 = vpack.c.bf16 %v1159_v52, %v1158_v25 }
 0x1c0   : > { %2099 = vmatmul.mubr.f32.gmra.mrb[12].mxu1 %v748_v39  ;;  %2283 = vmatpush3.bf16.msra.mxu0 %v2280_v7 }
 0x1c1   : > { %v2488_v59 = vpop.eup %2487  ;;  %v725_v57 = vsel %vm724_vm12, %v722_v60, %v719_v58 }
 0x1c2   : > { %v749_v16 = vsel %vm557_vm13, %v3189_v35, %v725_v57  ;;  %v728_v61 = vmul.f32 0.6931472, %v2488_v59  ;;  %v2284_v35 = vpack.c.bf16 %v1147_v13, %v1146_v10 }
 0x1c3   : > { %2101 = vmatprep.mubr.f32.mxu1 %v749_v16 }
 0x1c4   : > { %v734_v3 = vsel %vm733_vm14, %v731_v62, %v728_v61  ;;  %2285 = vmatprep.subr.bf16.mxu0 %v2284_v35 }
 0x1c5   : > { %v750_v1 = vsel %vm558_vm15, %v3184_v29, %v734_v3  ;;  %2287 = vmatpush3.bf16.msra.mxu0 %v2284_v35  ;;  %v1153_v29 = vld [vmem:[#allocation7 + $0xc8] sm:$0xff] }
 0x1c6   : > { %2102 = vmatmul.mubr.f32.gmra.mrb[14].mxu1 %v750_v1  ;;  %2289 = vmatprep.subr.bf16.mxu0 %v2288_v54  ;;  %v2296_v24 = vpack.c.bf16 %v1153_v29, %v1152_v17 }
 0x1c9   : > { %2291 = vmatpush3.bf16.msra.mxu0 %v2288_v54 }
 0x1ca   : > { %2293 = vmatprep.subr.bf16.mxu0 %v2292_v15 }
 0x1cd   : > { %2295 = vmatpush3.bf16.msra.mxu0 %v2292_v15 }
 0x1ce   : > { %2297 = vmatprep.subr.bf16.mxu0 %v2296_v24 }
 0x1d1   : > { %2299 = vmatpush3.bf16.msra.mxu0 %v2296_v24 }
 0x1d2   : > { %2301 = vmatprep.subr.bf16.mxu0 %v2300_v20 }
 0x1d5   : > { %2303 = vmatpush3.bf16.msra.mxu0 %v2300_v20 }
 0x1d6   : > { %2305 = vmatprep.subr.bf16.mxu0 %v2304_v63 }
 0x1d9   : > { %2307 = vmatpush3.bf16.msra.mxu0 %v2304_v63 }
 0x1da   : > { %2309 = vmatprep.subr.bf16.mxu0 %v2308_v26 }
 0x1dd   : > { %2311 = vmatpush3.bf16.msra.mxu0 %v2308_v26 }
 0x273   : > { %v2082_v36 = vpop.f32.mrb[0].mxu1 }
 0x274   : > { %v3334_v28 = vadd.f32 %v2082_v36, %v3331_v9  ;;  %v840_v30 = vpop.f32.mrb[1].mxu1 }
 0x275   : > { %v3337_v31 = vadd.f32 %v3331_v9, %v840_v30 }
 0x276   : > { %v920_v34 = vmin.f32 %v3334_v28, 20.0  ;;  %vm936_vm3 = vcmp.gt.f32.partialorder %v3334_v28, 20.0 }
 0x277   : > { %v919_v38 = vmin.f32 %v3337_v31, 20.0  ;;  %vm935_vm0 = vcmp.gt.f32.partialorder %v3337_v31, 20.0 }
 0x278   : > { %v953_v40 = vmul.f32 1.442695, %v920_v34 }
 0x279   : > { %v951_v8 = vmul.f32 1.442695, %v919_v38  ;;  %v2085_v41 = vpop.f32.mrb[2].mxu1 }
 0x27a   : > { %2489 = vpow2.f32 %v953_v40  ;;  %v3342_v33 = vadd.f32 %v2085_v41, %v3331_v9  ;;  %v850_v22 = vpop.f32.mrb[3].mxu1 }
 0x27b   : > { %2491 = vpow2.f32 %v951_v8  ;;  %v3345_v0 = vadd.f32 %v3331_v9, %v850_v22 }
 0x27c   : > { %v922_v42 = vmin.f32 %v3342_v33, 20.0  ;;  %vm938_vm4 = vcmp.gt.f32.partialorder %v3342_v33, 20.0 }
 0x27d   : > { %v921_v19 = vmin.f32 %v3345_v0, 20.0  ;;  %vm937_vm5 = vcmp.gt.f32.partialorder %v3345_v0, 20.0 }
 0x27e   : > { %v957_v43 = vmul.f32 1.442695, %v922_v42  ;;  %v2088_v47 = vpop.f32.mrb[4].mxu1 }
 0x27f   : > { %v955_v44 = vmul.f32 1.442695, %v921_v19  ;;  %v3350_v48 = vadd.f32 %v2088_v47, %v3331_v9  ;;  %v860_v49 = vpop.f32.mrb[5].mxu1 }
 0x280   : > { %2493 = vpow2.f32 %v957_v43  ;;  %v3353_v11 = vadd.f32 %v3331_v9, %v860_v49 }
 0x281   : > { %2495 = vpow2.f32 %v955_v44  ;;  %v924_v46 = vmin.f32 %v3350_v48, 20.0  ;;  %vm940_vm9 = vcmp.gt.f32.partialorder %v3350_v48, 20.0 }
 0x282   : > { %v923_v53 = vmin.f32 %v3353_v11, 20.0  ;;  %vm939_vm8 = vcmp.gt.f32.partialorder %v3353_v11, 20.0 }
 0x283   : > { %v961_v39 = vmul.f32 1.442695, %v924_v46 }
 0x284   : > { %v2490_v4 = vpop.eup %2489  ;;  %v2091_v37 = vpop.f32.mrb[6].mxu1  ;;  %v959_v60 = vmul.f32 1.442695, %v923_v53 }
 0x285   : > { %v2492_v50 = vpop.eup %2491  ;;  %v992_v51 = vadd.f32 1.0, %v2490_v4  ;;  %v995_v2 = vmul.f32 -0.5, %v2490_v4  ;;  %v870_v58 = vpop.f32.mrb[7].mxu1  ;;  %v3358_v45 = vadd.f32 %v2091_v37, %v3331_v9  ;;  %v998_v61 = vand.u32 2147483647, %v2490_v4 }
 0x286   : > { %v983_v55 = vadd.f32 1.0, %v2492_v50  ;;  %v3361_v59 = vadd.f32 %v3331_v9, %v870_v58  ;;  %v986_v62 = vmul.f32 -0.5, %v2492_v50  ;;  %v989_v3 = vand.u32 2147483647, %v2492_v50 }
 0x287   : > { %2497 = vlog2.f32 %v992_v51  ;;  %v926_v57 = vmin.f32 %v3358_v45, 20.0  ;;  %v996_v32 = vadd.f32 1.0, %v995_v2  ;;  %vm3375_vm1 = vcmp.lt.f32.partialorder %v998_v61, 0.0004427343 }
 0x288   : > { %2499 = vlog2.f32 %v983_v55  ;;  %v925_v16 = vmin.f32 %v3361_v59, 20.0  ;;  %v987_v17 = vadd.f32 1.0, %v986_v62  ;;  %vm3381_vm2 = vcmp.lt.f32.partialorder %v989_v3, 0.0004427343 }
 0x289   : > { %2501 = vpow2.f32 %v961_v39  ;;  %v965_v6 = vmul.f32 1.442695, %v926_v57  ;;  %v2094_v10 = vpop.f32.mrb[8].mxu1  ;;  %v997_v29 = vmul.f32 %v2490_v4, %v996_v32  ;;  %vm941_vm13 = vcmp.gt.f32.partialorder %v3361_v59, 20.0 }
 0x28a   : > { %2503 = vpow2.f32 %v959_v60  ;;  %v3365_v1 = vpop.eup %2493  ;;  %v963_v7 = vmul.f32 1.442695, %v925_v16  ;;  %v3368_v27 = vadd.f32 %v2094_v10, %v3331_v9  ;;  %v880_v35 = vpop.f32.mrb[9].mxu1  ;;  %v988_v22 = vmul.f32 %v2492_v50, %v987_v17 }
 0x28b   : > { %v2496_v13 = vpop.eup %2495  ;;  %v1010_v12 = vadd.f32 1.0, %v3365_v1  ;;  %2505 = vpow2.f32 %v965_v6  ;;  %v3372_v54 = vadd.f32 %v3331_v9, %v880_v35  ;;  %v1013_v25 = vmul.f32 -0.5, %v3365_v1 }
 0x28c   : > { %v1001_v5 = vadd.f32 1.0, %v2496_v13  ;;  %2507 = vpow2.f32 %v963_v7  ;;  %v928_v15 = vmin.f32 %v3368_v27, 20.0  ;;  %v1004_v63 = vmul.f32 -0.5, %v2496_v13 }
 0x28d   : > { %v927_v24 = vmin.f32 %v3372_v54, 20.0  ;;  %v2097_v56 = vpop.f32.mrb[10].mxu1  ;;  %v1016_v34 = vand.u32 2147483647, %v3365_v1  ;;  %v1007_v44 = vand.u32 2147483647, %v2496_v13 }
 0x28e   : > { %2509 = vlog2.f32 %v1001_v5  ;;  %v3386_v21 = vadd.f32 %v2097_v56, %v3331_v9  ;;  %v890_v23 = vpop.f32.mrb[11].mxu1  ;;  %v969_v40 = vmul.f32 1.442695, %v928_v15  ;;  %v1005_v4 = vadd.f32 1.0, %v1004_v63 }
 0x28f   : > { %2511 = vlog2.f32 %v1010_v12  ;;  %v967_v36 = vmul.f32 1.442695, %v927_v24  ;;  %v3390_v30 = vadd.f32 %v3331_v9, %v890_v23  ;;  %v1014_v46 = vadd.f32 1.0, %v1013_v25 }
 0x290   : > { %v930_v8 = vmin.f32 %v3386_v21, 20.0  ;;  %vm3417_vm6 = vcmp.lt.f32.partialorder %v1016_v34, 0.0004427343  ;;  %v1006_v16 = vmul.f32 %v2496_v13, %v1005_v4  ;;  %vm3426_vm7 = vcmp.lt.f32.partialorder %v1007_v44, 0.0004427343 }
 0x291   : > { %v2498_v20 = vpop.eup %2497  ;;  %2513 = vpow2.f32 %v967_v36  ;;  %v929_v43 = vmin.f32 %v3390_v30, 20.0  ;;  %v1015_v32 = vmul.f32 %v3365_v1, %v1014_v46  ;;  %vm942_vm15 = vcmp.gt.f32.partialorder %v3358_v45, 20.0 }
 0x292   : > { %v2500_v52 = vpop.eup %2499  ;;  %v994_v26 = vmul.f32 0.6931472, %v2498_v20  ;;  %v973_v47 = vmul.f32 1.442695, %v930_v8  ;;  %2515 = vpow2.f32 %v969_v40 }
 0x293   : > { %v3393_v38 = vpop.eup %2501  ;;  %v985_v41 = vmul.f32 0.6931472, %v2500_v52  ;;  %v971_v55 = vmul.f32 1.442695, %v929_v43  ;;  %v2100_v2 = vpop.f32.mrb[12].mxu1 }
 0x294   : > { %v3396_v42 = vpop.eup %2503  ;;  %v1000_v19 = vsel %vm3375_vm1, %v997_v29, %v994_v26  ;;  %v1028_v53 = vadd.f32 1.0, %v3393_v38  ;;  %2517 = vpow2.f32 %v973_v47  ;;  %v3414_v58 = vadd.f32 %v2100_v2, %v3331_v9  ;;  %v900_v60 = vpop.f32.mrb[13].mxu1 }
 0x295   : > { %v991_v49 = vsel %vm3381_vm2, %v988_v22, %v985_v41  ;;  %v1019_v51 = vadd.f32 1.0, %v3396_v42  ;;  %v1128_v37 = vsel %vm936_vm3, %v3334_v28, %v1000_v19  ;;  %v3411_v39 = vpop.eup %2505  ;;  %v3424_v57 = vadd.f32 %v3331_v9, %v900_v60 }
 0x296   : > { %v1127_v50 = vsel %vm935_vm0, %v3337_v31, %v991_v49  ;;  %v3421_v28 = vpop.eup %2507  ;;  %v932_v3 = vmin.f32 %v3414_v58, 20.0  ;;  %v1022_v13 = vmul.f32 -0.5, %v3396_v42  ;;  %v1025_v5 = vand.u32 2147483647, %v3396_v42 }
 0x297   : > { %2136 = vmatprep.mubr.f32.mxu0 %v1127_v50  ;;  %2519 = vlog2.f32 %v1019_v51  ;;  %v1037_v6 = vadd.f32 1.0, %v3421_v28  ;;  %v931_v10 = vmin.f32 %v3424_v57, 20.0  ;;  %v1031_v14 = vmul.f32 -0.5, %v3393_v38 }
 0x298   : > { %2137 = vmatmul.mubr.f32.vlgmr.msra.gmra.mrb[16].mxu0 %v1128_v37  ;;  %v2510_v62 = vpop.eup %2509  ;;  %2521 = vlog2.f32 %v1028_v53  ;;  %v1040_v29 = vmul.f32 -0.5, %v3421_v28  ;;  %v1046_v24 = vadd.f32 1.0, %v3411_v39  ;;  %v977_v18 = vmul.f32 1.442695, %v932_v3 }
 0x299   : > { %v2512_v7 = vpop.eup %2511  ;;  %2523 = vpow2.f32 %v971_v55  ;;  %v1003_v35 = vmul.f32 0.6931472, %v2510_v62  ;;  %v975_v15 = vmul.f32 1.442695, %v931_v10  ;;  %v2103_v17 = vpop.f32.mrb[14].mxu1  ;;  %v1023_v40 = vadd.f32 1.0, %v1022_v13 }
 0x29a   : > { %v1012_v12 = vmul.f32 0.6931472, %v2512_v7  ;;  %2525 = vlog2.f32 %v1037_v6  ;;  %v3444_v20 = vadd.f32 %v2103_v17, %v3331_v9  ;;  %v910_v23 = vpop.f32.mrb[15].mxu1  ;;  %v1034_v36 = vand.u32 2147483647, %v3393_v38 }
 0x29b   : > { %v1009_v1 = vsel %vm3426_vm7, %v1006_v16, %v1003_v35  ;;  %v3441_v56 = vpop.eup %2513  ;;  %2527 = vpow2.f32 %v975_v15  ;;  %v3452_v52 = vadd.f32 %v3331_v9, %v910_v23  ;;  %v1032_v8 = vadd.f32 1.0, %v1031_v14 }
 0x29c   : > { %v1129_v63 = vsel %vm937_vm5, %v3345_v0, %v1009_v1  ;;  %v1018_v25 = vsel %vm3417_vm6, %v1015_v32, %v1012_v12  ;;  %v934_v34 = vmin.f32 %v3444_v20, 20.0  ;;  %2529 = vlog2.f32 %v1046_v24  ;;  %v3459_v0 = vpop.eup %2515 }
 0x29d   : > { %2139 = vmatprep.mubr.f32.mxu0 %v1129_v63  ;;  %v1130_v26 = vsel %vm938_vm4, %v3342_v33, %v1018_v25  ;;  %v933_v41 = vmin.f32 %v3452_v52, 20.0  ;;  %v1055_v9 = vadd.f32 1.0, %v3441_v56  ;;  %2531 = vpow2.f32 %v977_v18 }
 0x29e   : > { %2140 = vmatmul.mubr.f32.gmra.mrb[18].mxu0 %v1130_v26  ;;  %v3465_v22 = vpop.eup %2517  ;;  %v981_v33 = vmul.f32 1.442695, %v934_v34  ;;  %v1041_v19 = vadd.f32 1.0, %v1040_v29  ;;  %v1049_v43 = vmul.f32 -0.5, %v3411_v39  ;;  %vm3468_vm10 = vcmp.lt.f32.partialorder %v1025_v5, 0.0004427343 }
 0x29f   : > { %v979_v47 = vmul.f32 1.442695, %v933_v41  ;;  %vm3472_vm11 = vcmp.lt.f32.partialorder %v1034_v36, 0.0004427343  ;;  %2533 = vlog2.f32 %v1055_v9  ;;  %v1024_v46 = vmul.f32 %v3396_v42, %v1023_v40 }
 0x2a0   : > { %v1033_v53 = vmul.f32 %v3393_v38, %v1032_v8  ;;  %v1043_v37 = vand.u32 2147483647, %v3421_v28  ;;  %2535 = vpow2.f32 %v981_v33  ;;  %v1058_v60 = vmul.f32 -0.5, %v3441_v56 }
 0x2a1   : > { %v2520_v44 = vpop.eup %2519  ;;  %v1064_v31 = vadd.f32 1.0, %v3459_v0  ;;  %2537 = vpow2.f32 %v979_v47  ;;  %v1042_v62 = vmul.f32 %v3421_v28, %v1041_v19  ;;  %v1050_v42 = vadd.f32 1.0, %v1049_v43 }
 0x2a2   : > { %v2522_v51 = vpop.eup %2521  ;;  %v1021_v50 = vmul.f32 0.6931472, %v2520_v44  ;;  %vm1044_vm12 = vcmp.lt.f32.partialorder %v1043_v37, 0.0004427343  ;;  %v1052_v7 = vand.u32 2147483647, %v3411_v39 }
 0x2a3   : > { %v3479_v55 = vpop.eup %2523  ;;  %v1030_v2 = vmul.f32 0.6931472, %v2522_v51  ;;  %2539 = vlog2.f32 %v1064_v31  ;;  %v1059_v35 = vadd.f32 1.0, %v1058_v60  ;;  %v1067_v5 = vmul.f32 -0.5, %v3459_v0 }
 0x2a4   : > { %v2526_v16 = vpop.eup %2525  ;;  %v1027_v61 = vsel %vm3468_vm10, %v1024_v46, %v1021_v50  ;;  %v1073_v28 = vadd.f32 1.0, %v3479_v55  ;;  %v1051_v15 = vmul.f32 %v3411_v39, %v1050_v42  ;;  %v1061_v17 = vand.u32 2147483647, %v3441_v56 }
 0x2a5   : > { %v1131_v38 = vsel %vm939_vm8, %v3353_v11, %v1027_v61  ;;  %v1036_v3 = vsel %vm3472_vm11, %v1033_v53, %v1030_v2  ;;  %v1039_v32 = vmul.f32 0.6931472, %v2526_v16  ;;  %v3496_v10 = vpop.eup %2527  ;;  %vm1053_vm14 = vcmp.lt.f32.partialorder %v1052_v7, 0.0004427343 }
 0x2a6   : > { %2142 = vmatprep.mubr.f32.mxu0 %v1131_v38  ;;  %v1132_v6 = vsel %vm940_vm9, %v3350_v48, %v1036_v3  ;;  %v2530_v13 = vpop.eup %2529  ;;  %2541 = vlog2.f32 %v1073_v28  ;;  %v1082_v48 = vadd.f32 1.0, %v3465_v22  ;;  %v1076_v29 = vmul.f32 -0.5, %v3479_v55 }
 0x2a7   : > { %2143 = vmatmul.mubr.f32.gmra.mrb[20].mxu0 %v1132_v6  ;;  %v1045_v11 = vsel %vm1044_vm12, %v1042_v62, %v1039_v32  ;;  %v1048_v14 = vmul.f32 0.6931472, %v2530_v13  ;;  %v3504_v1 = vpop.eup %2531  ;;  %v1091_v24 = vadd.f32 1.0, %v3496_v10  ;;  %v1060_v23 = vmul.f32 %v3441_v56, %v1059_v35 }
 0x2a8   : > { %v1133_v12 = vsel %vm941_vm13, %v3361_v59, %v1045_v11  ;;  %2543 = vlog2.f32 %v1082_v48  ;;  %v1068_v39 = vadd.f32 1.0, %v1067_v5  ;;  %vm943_vm0 = vcmp.gt.f32.partialorder %v3372_v54, 20.0 }
 0x2a9   : > { %2145 = vmatprep.mubr.f32.mxu0 %v1133_v12  ;;  %v2534_v59 = vpop.eup %2533  ;;  %v1054_v18 = vsel %vm1053_vm14, %v1051_v15, %v1048_v14  ;;  %2545 = vlog2.f32 %v1091_v24  ;;  %vm1062_vm1 = vcmp.lt.f32.partialorder %v1061_v17, 0.0004427343  ;;  %v1070_v36 = vand.u32 2147483647, %v3459_v0 }
 0x2aa   : > { %v1134_v63 = vsel %vm942_vm15, %v3358_v45, %v1054_v18  ;;  %v1057_v25 = vmul.f32 0.6931472, %v2534_v59  ;;  %v3511_v26 = vpop.eup %2535  ;;  %v1085_v34 = vmul.f32 -0.5, %v3465_v22  ;;  %v1077_v41 = vadd.f32 1.0, %v1076_v29 }
 0x2ab   : > { %2146 = vmatmul.mubr.f32.gmra.mrb[22].mxu0 %v1134_v63  ;;  %v3516_v40 = vpop.eup %2537  ;;  %v1094_v56 = vmul.f32 -0.5, %v3496_v10  ;;  %v1100_v45 = vadd.f32 1.0, %v3504_v1  ;;  %vm944_vm2 = vcmp.gt.f32.partialorder %v3368_v27, 20.0  ;;  %v1069_v43 = vmul.f32 %v3459_v0, %v1068_v39  ;;  %v1538_v39 = vld [vmem:[#allocation8 + $0x8] sm:$0xff] }
 0x2ac   : > { %v1063_v8 = vsel %vm1062_vm1, %v1060_v23, %v1057_v25  ;;  %v1079_v44 = vand.u32 2147483647, %v3479_v55  ;;  %vm1071_vm3 = vcmp.lt.f32.partialorder %v1070_v36, 0.0004427343  ;;  %v1086_v47 = vadd.f32 1.0, %v1085_v34  ;;  %v1537_v25 = vld [vmem:[#allocation8] sm:$0xff] }
 0x2ad   : > { %v2540_v9 = vpop.eup %2539  ;;  %v1135_v33 = vsel %vm943_vm0, %v3372_v54, %v1063_v8  ;;  %2547 = vlog2.f32 %v1100_v45  ;;  %v1088_v49 = vand.u32 2147483647, %v3465_v22  ;;  %v1109_v4 = vadd.f32 1.0, %v3516_v40  ;;  %v1539_v36 = vld [vmem:[#allocation8 + $0x10] sm:$0xff]  ;;  %v1544_v45 = vld [vmem:[#allocation8 + $0x38] sm:$0xff] }
 0x2ae   : > { %2148 = vmatprep.mubr.f32.mxu0 %v1135_v33  ;;  %v1066_v19 = vmul.f32 0.6931472, %v2540_v9  ;;  %v1078_v46 = vmul.f32 %v3479_v55, %v1077_v41  ;;  %v1095_v54 = vadd.f32 1.0, %v1094_v56  ;;  %v1118_v53 = vadd.f32 1.0, %v3511_v26  ;;  %v1542_v41 = vld [vmem:[#allocation8 + $0x28] sm:$0xff]  ;;  %v1545_v33 = vld [vmem:[#allocation8 + $0x40] sm:$0xff] }
 0x2af   : > { %v1103_v0 = vmul.f32 -0.5, %v3504_v1  ;;  %2549 = vlog2.f32 %v1109_v4  ;;  %vm945_vm4 = vcmp.gt.f32.partialorder %v3390_v30, 20.0  ;;  %vm1080_vm5 = vcmp.lt.f32.partialorder %v1079_v44, 0.0004427343  ;;  %v1548_v44 = vld [vmem:[#allocation8 + $0x58] sm:$0xff]  ;;  %v1550_v4 = vld [vmem:[#allocation8 + $0x68] sm:$0xff] }
 0x2b0   : > { %v2542_v51 = vpop.eup %2541  ;;  %v1072_v50 = vsel %vm1071_vm3, %v1069_v43, %v1066_v19  ;;  %v1097_v31 = vand.u32 2147483647, %v3496_v10  ;;  %2551 = vlog2.f32 %v1118_v53  ;;  %vm946_vm6 = vcmp.gt.f32.partialorder %v3386_v21, 20.0  ;;  %v1547_v43 = vld [vmem:[#allocation8 + $0x50] sm:$0xff]  ;;  %v3556_v53 = vld [vmem:[%s3850_s4 + $0x1] ss:$0 sm:$0xff] }
 0x2b1   : > { %v1136_v37 = vsel %vm944_vm2, %v3368_v27, %v1072_v50  ;;  %v1075_v2 = vmul.f32 0.6931472, %v2542_v51  ;;  %v1087_v61 = vmul.f32 %v3465_v22, %v1086_v47  ;;  %vm1089_vm7 = vcmp.lt.f32.partialorder %v1088_v49, 0.0004427343  ;;  %v1549_v49 = vld [vmem:[#allocation8 + $0x60] sm:$0xff]  ;;  %v1551_v50 = vld [vmem:[#allocation8 + $0x70] sm:$0xff] }
 0x2b2   : > { %v2544_v60 = vpop.eup %2543  ;;  %2149 = vmatmul.mubr.f32.gmra.mrb[24].mxu0 %v1136_v37  ;;  %v1096_v42 = vmul.f32 %v3496_v10, %v1095_v54  ;;  %v1112_v38 = vmul.f32 -0.5, %v3516_v40  ;;  %v1104_v6 = vadd.f32 1.0, %v1103_v0  ;;  %v1121_v7 = vmul.f32 -0.5, %v3511_v26 }
 0x2b3   : > { %v1081_v16 = vsel %vm1080_vm5, %v1078_v46, %v1075_v2  ;;  %v1084_v55 = vmul.f32 0.6931472, %v2544_v60  ;;  %v2546_v62 = vpop.eup %2545  ;;  %vm1098_vm8 = vcmp.lt.f32.partialorder %v1097_v31, 0.0004427343  ;;  %v1106_v11 = vand.u32 2147483647, %v3504_v1 }
 0x2b4   : > { %v1137_v27 = vsel %vm945_vm4, %v3390_v30, %v1081_v16  ;;  %v1093_v32 = vmul.f32 0.6931472, %v2546_v62  ;;  %vm947_vm9 = vcmp.gt.f32.partialorder %v3424_v57, 20.0  ;;  %v1113_v35 = vadd.f32 1.0, %v1112_v38  ;;  %v1552_v46 = vld [vmem:[#allocation8 + $0x78] sm:$0xff] }
 0x2b5   : > { %2151 = vmatprep.mubr.f32.mxu0 %v1137_v27  ;;  %v1090_v3 = vsel %vm1089_vm7, %v1087_v61, %v1084_v55  ;;  %v1105_v12 = vmul.f32 %v3504_v1, %v1104_v6  ;;  %v1115_v5 = vand.u32 2147483647, %v3516_v40  ;;  %v1122_v48 = vadd.f32 1.0, %v1121_v7 }
 0x2b6   : > { %v1138_v28 = vsel %vm946_vm6, %v3386_v21, %v1090_v3  ;;  %v1099_v30 = vsel %vm1098_vm8, %v1096_v42, %v1093_v32  ;;  %vm1107_vm10 = vcmp.lt.f32.partialorder %v1106_v11, 0.0004427343  ;;  %v1124_v21 = vand.u32 2147483647, %v3511_v26 }
 0x2b7   : > { %2152 = vmatmul.mubr.f32.gmra.mrb[26].mxu0 %v1138_v28  ;;  %v2548_v22 = vpop.eup %2547  ;;  %v1139_v10 = vsel %vm947_vm9, %v3424_v57, %v1099_v30  ;;  %vm948_vm11 = vcmp.gt.f32.partialorder %v3414_v58, 20.0  ;;  %v1114_v57 = vmul.f32 %v3516_v40, %v1113_v35  ;;  %vm1116_vm12 = vcmp.lt.f32.partialorder %v1115_v5, 0.0004427343  ;;  %v1540_v40 = vld [vmem:[#allocation8 + $0x18] sm:$0xff] }
 0x2b8   : > { %2154 = vmatprep.mubr.f32.mxu0 %v1139_v10  ;;  %v1102_v13 = vmul.f32 0.6931472, %v2548_v22  ;;  %v1123_v1 = vmul.f32 %v3511_v26, %v1122_v48  ;;  %vm949_vm13 = vcmp.gt.f32.partialorder %v3452_v52, 20.0  ;;  %vm1125_vm14 = vcmp.lt.f32.partialorder %v1124_v21, 0.0004427343  ;;  %v1541_v26 = vld [vmem:[#allocation8 + $0x20] sm:$0xff] }
 0x2b9   : > { %v2550_v14 = vpop.eup %2549  ;;  %vm950_vm15 = vcmp.gt.f32.partialorder %v3444_v20, 20.0  ;;  %v2312_v34 = vpack.c.bf16 %v1538_v39, %v1537_v25  ;;  %v2316_v8 = vpack.c.bf16 %v1540_v40, %v1539_v36  ;;  %v2320_v56 = vpack.c.bf16 %v1542_v41, %v1541_v26 }
 0x2ba   : > { %v1108_v15 = vsel %vm1107_vm10, %v1105_v12, %v1102_v13  ;;  %v2552_v17 = vpop.eup %2551  ;;  %v1111_v24 = vmul.f32 0.6931472, %v2550_v14  ;;  %v2332_v47 = vpack.c.bf16 %v1548_v44, %v1547_v43  ;;  %v2336_v51 = vpack.c.bf16 %v1550_v4, %v1549_v49 }
 0x2bb   : > { %v1140_v29 = vsel %vm948_vm11, %v3414_v58, %v1108_v15  ;;  %v1120_v59 = vmul.f32 0.6931472, %v2552_v17  ;;  %2313 = vmatprep.subr.bf16.mxu1 %v2312_v34  ;;  %v2340_v54 = vpack.c.bf16 %v1552_v46, %v1551_v50 }
 0x2bc   : > { %2155 = vmatmul.mubr.f32.gmra.mrb[28].mxu0 %v1140_v29  ;;  %v1117_v18 = vsel %vm1116_vm12, %v1114_v57, %v1111_v24  ;;  %2315 = vmatpush3.bf16.msra.mxu1 %v2312_v34 }
 0x2bd   : > { %v1141_v23 = vsel %vm949_vm13, %v3452_v52, %v1117_v18  ;;  %v1126_v63 = vsel %vm1125_vm14, %v1123_v1, %v1120_v59  ;;  %2317 = vmatprep.subr.bf16.mxu1 %v2316_v8  ;;  %v1543_v52 = vld [vmem:[#allocation8 + $0x30] sm:$0xff] }
 0x2be   : > { %2157 = vmatprep.mubr.f32.mxu0 %v1141_v23  ;;  %v1142_v58 = vsel %vm950_vm15, %v3444_v20, %v1126_v63  ;;  %v2324_v9 = vpack.c.bf16 %v1544_v45, %v1543_v52  ;;  %v1546_v20 = vld [vmem:[#allocation8 + $0x48] sm:$0xff] }
 0x2bf   : > { %v2328_v19 = vpack.c.bf16 %v1546_v20, %v1545_v33 }
 0x2c0   : > { %2158 = vmatmul.mubr.f32.gmra.mrb[30].mxu0 %v1142_v58  ;;  %2319 = vmatpush3.bf16.msra.mxu1 %v2316_v8 }
 0x2c1   : > { %2321 = vmatprep.subr.bf16.mxu1 %v2320_v56 }
 0x2c4   : > { %2323 = vmatpush3.bf16.msra.mxu1 %v2320_v56 }
 0x2c5   : > { %2325 = vmatprep.subr.bf16.mxu1 %v2324_v9 }
 0x2c8   : > { %2327 = vmatpush3.bf16.msra.mxu1 %v2324_v9 }
 0x2c9   : > { %2329 = vmatprep.subr.bf16.mxu1 %v2328_v19 }
 0x2cc   : > { %2331 = vmatpush3.bf16.msra.mxu1 %v2328_v19 }
 0x2cd   : > { %2333 = vmatprep.subr.bf16.mxu1 %v2332_v47 }
 0x2d0   : > { %2335 = vmatpush3.bf16.msra.mxu1 %v2332_v47 }
 0x2d1   : > { %2337 = vmatprep.subr.bf16.mxu1 %v2336_v51 }
 0x2d4   : > { %2339 = vmatpush3.bf16.msra.mxu1 %v2336_v51 }
 0x2d5   : > { %2341 = vmatprep.subr.bf16.mxu1 %v2340_v54 }
 0x2d8   : > { %2343 = vmatpush3.bf16.msra.mxu1 %v2340_v54 }
 0x36b   : > { %v2138_v37 = vpop.f32.mrb[16].mxu0 }
 0x36c   : > { %v3559_v2 = vadd.f32 %v2138_v37, %v3556_v53  ;;  %v1234_v0 = vpop.f32.mrb[17].mxu0 }
 0x36d   : > { %v3562_v60 = vadd.f32 %v3556_v53, %v1234_v0 }
 0x36e   : > { %v1314_v31 = vmin.f32 %v3559_v2, 20.0  ;;  %vm1330_vm0 = vcmp.gt.f32.partialorder %v3559_v2, 20.0 }
 0x36f   : > { %v1313_v16 = vmin.f32 %v3562_v60, 20.0  ;;  %vm1329_vm3 = vcmp.gt.f32.partialorder %v3562_v60, 20.0 }
 0x370   : > { %v1347_v55 = vmul.f32 1.442695, %v1314_v31 }
 0x371   : > { %v1345_v61 = vmul.f32 1.442695, %v1313_v16  ;;  %v2141_v62 = vpop.f32.mrb[18].mxu0 }
 0x372   : > { %2553 = vpow2.f32 %v1347_v55  ;;  %v3567_v27 = vadd.f32 %v2141_v62, %v3556_v53  ;;  %v1244_v42 = vpop.f32.mrb[19].mxu0 }
 0x373   : > { %2555 = vpow2.f32 %v1345_v61  ;;  %v3570_v38 = vadd.f32 %v3556_v53, %v1244_v42 }
 0x374   : > { %v1316_v3 = vmin.f32 %v3567_v27, 20.0  ;;  %vm1332_vm4 = vcmp.gt.f32.partialorder %v3567_v27, 20.0 }
 0x375   : > { %v1315_v32 = vmin.f32 %v3570_v38, 20.0  ;;  %vm1331_vm7 = vcmp.gt.f32.partialorder %v3570_v38, 20.0 }
 0x376   : > { %v1351_v6 = vmul.f32 1.442695, %v1316_v3 }
 0x377   : > { %v1349_v7 = vmul.f32 1.442695, %v1315_v32 }
 0x378   : > { %2557 = vpow2.f32 %v1351_v6 }
 0x379   : > { %2559 = vpow2.f32 %v1349_v7 }
 0x37a   : > { %v2144_v11 = vpop.f32.mrb[20].mxu0 }
 0x37b   : > { %v3575_v10 = vadd.f32 %v2144_v11, %v3556_v53  ;;  %v1254_v35 = vpop.f32.mrb[21].mxu0 }
 0x37c   : > { %v2554_v28 = vpop.eup %2553  ;;  %v3578_v13 = vadd.f32 %v3556_v53, %v1254_v35 }
 0x37d   : > { %v2556_v30 = vpop.eup %2555  ;;  %v1386_v22 = vadd.f32 1.0, %v2554_v28  ;;  %v1318_v5 = vmin.f32 %v3575_v10, 20.0  ;;  %v1389_v21 = vmul.f32 -0.5, %v2554_v28  ;;  %v1392_v63 = vand.u32 2147483647, %v2554_v28 }
 0x37e   : > { %v1377_v12 = vadd.f32 1.0, %v2556_v30  ;;  %v1317_v48 = vmin.f32 %v3578_v13, 20.0  ;;  %v2147_v17 = vpop.f32.mrb[22].mxu0  ;;  %v1380_v57 = vmul.f32 -0.5, %v2556_v30  ;;  %v1383_v8 = vand.u32 2147483647, %v2556_v30 }
 0x37f   : > { %2561 = vlog2.f32 %v1386_v22  ;;  %v1355_v14 = vmul.f32 1.442695, %v1318_v5  ;;  %v3583_v29 = vadd.f32 %v2147_v17, %v3556_v53  ;;  %v1264_v24 = vpop.f32.mrb[23].mxu0  ;;  %v1390_v23 = vadd.f32 1.0, %v1389_v21 }
 0x380   : > { %2563 = vlog2.f32 %v1377_v12  ;;  %v1353_v15 = vmul.f32 1.442695, %v1317_v48  ;;  %v3588_v1 = vadd.f32 %v3556_v53, %v1264_v24  ;;  %v1381_v40 = vadd.f32 1.0, %v1380_v57 }
 0x381   : > { %2565 = vpow2.f32 %v1355_v14  ;;  %v1320_v58 = vmin.f32 %v3583_v29, 20.0  ;;  %v1391_v56 = vmul.f32 %v2554_v28, %v1390_v23  ;;  %vm3597_vm1 = vcmp.lt.f32.partialorder %v1392_v63, 0.0004427343 }
 0x382   : > { %v3585_v59 = vpop.eup %2557  ;;  %2567 = vpow2.f32 %v1353_v15  ;;  %v1319_v39 = vmin.f32 %v3588_v1, 20.0  ;;  %v1382_v4 = vmul.f32 %v2556_v30, %v1381_v40  ;;  %vm1384_vm2 = vcmp.lt.f32.partialorder %v1383_v8, 0.0004427343 }
 0x383   : > { %v3590_v18 = vpop.eup %2559  ;;  %v1404_v25 = vadd.f32 1.0, %v3585_v59  ;;  %v1359_v34 = vmul.f32 1.442695, %v1320_v58  ;;  %v1407_v9 = vmul.f32 -0.5, %v3585_v59  ;;  %v1410_v54 = vand.u32 2147483647, %v3585_v59 }
 0x384   : > { %v1395_v36 = vadd.f32 1.0, %v3590_v18  ;;  %v1357_v26 = vmul.f32 1.442695, %v1319_v39  ;;  %v1398_v44 = vmul.f32 -0.5, %v3590_v18  ;;  %v1401_v46 = vand.u32 2147483647, %v3590_v18 }
 0x385   : > { %2569 = vlog2.f32 %v1404_v25  ;;  %v2150_v45 = vpop.f32.mrb[24].mxu0  ;;  %v1408_v16 = vadd.f32 1.0, %v1407_v9  ;;  %vm3637_vm6 = vcmp.lt.f32.partialorder %v1410_v54, 0.0004427343  ;;  %vm1333_vm8 = vcmp.gt.f32.partialorder %v3578_v13, 20.0 }
 0x386   : > { %2571 = vlog2.f32 %v1395_v36  ;;  %v3603_v19 = vadd.f32 %v2150_v45, %v3556_v53  ;;  %v1274_v43 = vpop.f32.mrb[25].mxu0  ;;  %v1399_v32 = vadd.f32 1.0, %v1398_v44  ;;  %vm3633_vm5 = vcmp.lt.f32.partialorder %v1401_v46, 0.0004427343 }
 0x387   : > { %2573 = vpow2.f32 %v1359_v34  ;;  %v3607_v47 = vadd.f32 %v3556_v53, %v1274_v43  ;;  %v1409_v17 = vmul.f32 %v3585_v59, %v1408_v16  ;;  %vm1334_vm9 = vcmp.gt.f32.partialorder %v3575_v10, 20.0 }
 0x388   : > { %2575 = vpow2.f32 %v1357_v26  ;;  %v1322_v50 = vmin.f32 %v3603_v19, 20.0  ;;  %v1400_v63 = vmul.f32 %v3590_v18, %v1399_v32  ;;  %vm1335_vm12 = vcmp.gt.f32.partialorder %v3588_v1, 20.0 }
 0x389   : > { %v2562_v41 = vpop.eup %2561  ;;  %v1321_v0 = vmin.f32 %v3607_v47, 20.0  ;;  %vm1336_vm15 = vcmp.gt.f32.partialorder %v3583_v29, 20.0 }
 0x38a   : > { %v2564_v33 = vpop.eup %2563  ;;  %v1388_v20 = vmul.f32 0.6931472, %v2562_v41  ;;  %v1363_v62 = vmul.f32 1.442695, %v1322_v50  ;;  %v2153_v42 = vpop.f32.mrb[26].mxu0 }
 0x38b   : > { %v1379_v49 = vmul.f32 0.6931472, %v2564_v33  ;;  %v3614_v37 = vpop.eup %2565  ;;  %v1361_v6 = vmul.f32 1.442695, %v1321_v0  ;;  %v3626_v7 = vadd.f32 %v2153_v42, %v3556_v53  ;;  %v1284_v28 = vpop.f32.mrb[27].mxu0 }
 0x38c   : > { %v1394_v51 = vsel %vm3597_vm1, %v1391_v56, %v1388_v20  ;;  %v3618_v55 = vpop.eup %2567  ;;  %v1422_v30 = vadd.f32 1.0, %v3614_v37  ;;  %2577 = vpow2.f32 %v1363_v62  ;;  %v1425_v48 = vmul.f32 -0.5, %v3614_v37 }
 0x38d   : > { %v1385_v31 = vsel %vm1384_vm2, %v1382_v4, %v1379_v49  ;;  %v1522_v61 = vsel %vm1330_vm0, %v3559_v2, %v1394_v51  ;;  %v1413_v11 = vadd.f32 1.0, %v3618_v55  ;;  %v3631_v2 = vadd.f32 %v3556_v53, %v1284_v28 }
 0x38e   : > { %v1521_v3 = vsel %vm1329_vm3, %v3562_v60, %v1385_v31  ;;  %2579 = vpow2.f32 %v1361_v6  ;;  %v1324_v12 = vmin.f32 %v3626_v7, 20.0  ;;  %v1416_v5 = vmul.f32 -0.5, %v3618_v55 }
 0x38f   : > { %2192 = vmatprep.mubr.f32.mxu1 %v1521_v3  ;;  %v2570_v35 = vpop.eup %2569  ;;  %v1323_v14 = vmin.f32 %v3631_v2, 20.0  ;;  %2581 = vlog2.f32 %v1413_v11  ;;  %v2156_v39 = vpop.f32.mrb[28].mxu0  ;;  %v1419_v34 = vand.u32 2147483647, %v3618_v55  ;;  %v1426_v26 = vadd.f32 1.0, %v1425_v48 }
 0x390   : > { %2193 = vmatmul.mubr.f32.vlgmr.msra.gmra.mrb[16].mxu1 %v1522_v61  ;;  %v2572_v21 = vpop.eup %2571  ;;  %v1406_v15 = vmul.f32 0.6931472, %v2570_v35  ;;  %v1367_v57 = vmul.f32 1.442695, %v1324_v12  ;;  %2583 = vlog2.f32 %v1422_v30  ;;  %v3656_v59 = vadd.f32 %v2156_v39, %v3556_v53  ;;  %v1294_v40 = vpop.f32.mrb[29].mxu0 }
 0x391   : > { %v3646_v24 = vpop.eup %2573  ;;  %v1397_v23 = vmul.f32 0.6931472, %v2572_v21  ;;  %v1365_v25 = vmul.f32 1.442695, %v1323_v14  ;;  %v1417_v18 = vadd.f32 1.0, %v1416_v5  ;;  %v3661_v41 = vadd.f32 %v3556_v53, %v1294_v40 }
 0x392   : > { %v3649_v58 = vpop.eup %2575  ;;  %v1412_v36 = vsel %vm3637_vm6, %v1409_v17, %v1406_v15  ;;  %v1326_v45 = vmin.f32 %v3656_v59, 20.0  ;;  %v1440_v33 = vadd.f32 1.0, %v3646_v24  ;;  %v1428_v4 = vand.u32 2147483647, %v3614_v37 }
 0x393   : > { %v1403_v8 = vsel %vm3633_vm5, %v1400_v63, %v1397_v23  ;;  %2585 = vpow2.f32 %v1365_v25  ;;  %v1431_v52 = vadd.f32 1.0, %v3649_v58  ;;  %v1524_v9 = vsel %vm1332_vm4, %v3567_v27, %v1412_v36  ;;  %v2159_v43 = vpop.f32.mrb[30].mxu0 }
 0x394   : > { %v1523_v56 = vsel %vm1331_vm7, %v3570_v38, %v1403_v8  ;;  %2587 = vpow2.f32 %v1367_v57  ;;  %v1325_v20 = vmin.f32 %v3661_v41, 20.0  ;;  %v1371_v38 = vmul.f32 1.442695, %v1326_v45  ;;  %v1304_v49 = vpop.f32.mrb[31].mxu0 }
 0x395   : > { %2195 = vmatprep.mubr.f32.mxu1 %v1523_v56  ;;  %2589 = vlog2.f32 %v1431_v52  ;;  %v3673_v44 = vadd.f32 %v2159_v43, %v3556_v53  ;;  %v3680_v50 = vadd.f32 %v3556_v53, %v1304_v49  ;;  %vm3682_vm10 = vcmp.lt.f32.partialorder %v1419_v34, 0.0004427343 }
 0x396   : > { %2196 = vmatmul.mubr.f32.gmra.mrb[18].mxu1 %v1524_v9  ;;  %v3677_v51 = vpop.eup %2577  ;;  %v1369_v27 = vmul.f32 1.442695, %v1325_v20  ;;  %2591 = vlog2.f32 %v1440_v33  ;;  %v1418_v31 = vmul.f32 %v3618_v55, %v1417_v18  ;;  %v1427_v16 = vmul.f32 %v3614_v37, %v1426_v26 }
 0x397   : > { %v1328_v0 = vmin.f32 %v3673_v44, 20.0  ;;  %v1434_v61 = vmul.f32 -0.5, %v3649_v58  ;;  %v1327_v53 = vmin.f32 %v3680_v50, 20.0  ;;  %v1443_v42 = vmul.f32 -0.5, %v3646_v24 }
 0x398   : > { %v3686_v54 = vpop.eup %2579  ;;  %2593 = vpow2.f32 %v1369_v27  ;;  %v1458_v11 = vadd.f32 1.0, %v3677_v51  ;;  %vm1429_vm11 = vcmp.lt.f32.partialorder %v1428_v4, 0.0004427343  ;;  %v1437_v22 = vand.u32 2147483647, %v3649_v58 }
 0x399   : > { %v2582_v62 = vpop.eup %2581  ;;  %v1449_v3 = vadd.f32 1.0, %v3686_v54  ;;  %2595 = vpow2.f32 %v1371_v38  ;;  %v1375_v6 = vmul.f32 1.442695, %v1328_v0  ;;  %v1373_v30 = vmul.f32 1.442695, %v1327_v53 }
 0x39a   : > { %v2584_v32 = vpop.eup %2583  ;;  %v1415_v28 = vmul.f32 0.6931472, %v2582_v62  ;;  %v1435_v60 = vadd.f32 1.0, %v1434_v61  ;;  %v1452_v48 = vmul.f32 -0.5, %v3686_v54  ;;  %v1444_v15 = vadd.f32 1.0, %v1443_v42 }
 0x39b   : > { %v1424_v55 = vmul.f32 0.6931472, %v2584_v32  ;;  %2597 = vlog2.f32 %v1449_v3  ;;  %v1446_v17 = vand.u32 2147483647, %v3646_v24  ;;  %v1461_v23 = vmul.f32 -0.5, %v3677_v51 }
 0x39c   : > { %2599 = vpow2.f32 %v1375_v6  ;;  %v1421_v37 = vsel %vm3682_vm10, %v1418_v31, %v1415_v28  ;;  %v1436_v25 = vmul.f32 %v3649_v58, %v1435_v60  ;;  %vm1438_vm13 = vcmp.lt.f32.partialorder %v1437_v22, 0.0004427343 }
 0x39d   : > { %v3699_v35 = vpop.eup %2585  ;;  %2601 = vpow2.f32 %v1373_v30  ;;  %v1525_v12 = vsel %vm1333_vm8, %v3578_v13, %v1421_v37  ;;  %v1430_v5 = vsel %vm1429_vm11, %v1427_v16, %v1424_v55  ;;  %v1453_v36 = vadd.f32 1.0, %v1452_v48 }
 0x39e   : > { %v3705_v21 = vpop.eup %2587  ;;  %2198 = vmatprep.mubr.f32.mxu1 %v1525_v12  ;;  %v1526_v14 = vsel %vm1334_vm9, %v3575_v10, %v1430_v5  ;;  %2603 = vlog2.f32 %v1458_v11  ;;  %v1467_v13 = vadd.f32 1.0, %v3699_v35  ;;  %v1445_v8 = vmul.f32 %v3646_v24, %v1444_v15 }
 0x39f   : > { %v2590_v57 = vpop.eup %2589  ;;  %2199 = vmatmul.mubr.f32.gmra.mrb[20].mxu1 %v1526_v14  ;;  %v1476_v10 = vadd.f32 1.0, %v3705_v21  ;;  %vm1447_vm14 = vcmp.lt.f32.partialorder %v1446_v17, 0.0004427343  ;;  %v1455_v56 = vand.u32 2147483647, %v3686_v54  ;;  %v1462_v52 = vadd.f32 1.0, %v1461_v23 }
 0x3a0   : > { %v1433_v63 = vmul.f32 0.6931472, %v2590_v57  ;;  %v2592_v39 = vpop.eup %2591  ;;  %2605 = vlog2.f32 %v1467_v13  ;;  %v1470_v9 = vmul.f32 -0.5, %v3699_v35  ;;  %v1454_v43 = vmul.f32 %v3686_v54, %v1453_v36 }
 0x3a1   : > { %v1442_v40 = vmul.f32 0.6931472, %v2592_v39  ;;  %2607 = vlog2.f32 %v1476_v10  ;;  %v1464_v49 = vand.u32 2147483647, %v3677_v51  ;;  %v1479_v4 = vmul.f32 -0.5, %v3705_v21 }
 0x3a2   : > { %v1439_v34 = vsel %vm1438_vm13, %v1436_v25, %v1433_v63  ;;  %v3717_v18 = vpop.eup %2593  ;;  %vm1337_vm0 = vcmp.gt.f32.partialorder %v3607_v47, 20.0  ;;  %vm1456_vm1 = vcmp.lt.f32.partialorder %v1455_v56, 0.0004427343  ;;  %v1463_v46 = vmul.f32 %v3677_v51, %v1462_v52 }
 0x3a3   : > { %v1527_v26 = vsel %vm1335_vm12, %v3588_v1, %v1439_v34  ;;  %v3721_v58 = vpop.eup %2595  ;;  %v1448_v45 = vsel %vm1447_vm14, %v1445_v8, %v1442_v40  ;;  %v1485_v33 = vadd.f32 1.0, %v3717_v18  ;;  %v1471_v31 = vadd.f32 1.0, %v1470_v9 }
 0x3a4   : > { %2201 = vmatprep.mubr.f32.mxu1 %v1527_v26  ;;  %v1528_v20 = vsel %vm1336_vm15, %v3583_v29, %v1448_v45  ;;  %v1494_v29 = vadd.f32 1.0, %v3721_v58  ;;  %v1473_v16 = vand.u32 2147483647, %v3699_v35  ;;  %v1488_v42 = vmul.f32 -0.5, %v3717_v18 }
 0x3a5   : > { %v2598_v24 = vpop.eup %2597  ;;  %2202 = vmatmul.mubr.f32.gmra.mrb[22].mxu1 %v1528_v20  ;;  %2609 = vlog2.f32 %v1485_v33  ;;  %vm1338_vm2 = vcmp.gt.f32.partialorder %v3603_v19, 20.0  ;;  %vm1465_vm3 = vcmp.lt.f32.partialorder %v1464_v49, 0.0004427343  ;;  %v1480_v51 = vadd.f32 1.0, %v1479_v4 }
 0x3a6   : > { %v3728_v1 = vpop.eup %2599  ;;  %v1451_v38 = vmul.f32 0.6931472, %v2598_v24  ;;  %2611 = vlog2.f32 %v1494_v29  ;;  %vm1339_vm4 = vcmp.gt.f32.partialorder %v3631_v2, 20.0  ;;  %v1482_v6 = vand.u32 2147483647, %v3705_v21 }
 0x3a7   : > { %v3732_v27 = vpop.eup %2601  ;;  %v1512_v28 = vadd.f32 1.0, %v3728_v1  ;;  %v1472_v30 = vmul.f32 %v3699_v35, %v1471_v31  ;;  %v1497_v55 = vmul.f32 -0.5, %v3721_v58  ;;  %vm1474_vm5 = vcmp.lt.f32.partialorder %v1473_v16, 0.0004427343 }
 0x3a8   : > { %v2604_v0 = vpop.eup %2603  ;;  %v1457_v54 = vsel %vm1456_vm1, %v1454_v43, %v1451_v38  ;;  %v1503_v61 = vadd.f32 1.0, %v3732_v27  ;;  %v1489_v60 = vadd.f32 1.0, %v1488_v42  ;;  %v1506_v22 = vmul.f32 -0.5, %v3732_v27 }
 0x3a9   : > { %v1529_v62 = vsel %vm1337_vm0, %v3607_v47, %v1457_v54  ;;  %v1460_v53 = vmul.f32 0.6931472, %v2604_v0  ;;  %v1481_v48 = vmul.f32 %v3705_v21, %v1480_v51  ;;  %v1491_v14 = vand.u32 2147483647, %v3717_v18 }
 0x3aa   : > { %2204 = vmatprep.mubr.f32.mxu1 %v1529_v62  ;;  %2613 = vlog2.f32 %v1503_v61  ;;  %v2606_v3 = vpop.eup %2605  ;;  %vm1340_vm6 = vcmp.gt.f32.partialorder %v3626_v7, 20.0  ;;  %vm1483_vm7 = vcmp.lt.f32.partialorder %v1482_v6, 0.0004427343  ;;  %v1498_v17 = vadd.f32 1.0, %v1497_v55 }
 0x3ab   : > { %v1466_v32 = vsel %vm1465_vm3, %v1463_v46, %v1460_v53  ;;  %v1469_v11 = vmul.f32 0.6931472, %v2606_v3  ;;  %v2608_v37 = vpop.eup %2607  ;;  %2615 = vlog2.f32 %v1512_v28  ;;  %v1500_v57 = vand.u32 2147483647, %v3721_v58 }
 0x3ac   : > { %v1530_v47 = vsel %vm1338_vm2, %v3603_v19, %v1466_v32  ;;  %v1478_v5 = vmul.f32 0.6931472, %v2608_v37  ;;  %v1515_v23 = vmul.f32 -0.5, %v3728_v1  ;;  %v1490_v63 = vmul.f32 %v3717_v18, %v1489_v60 }
 0x3ad   : > { %2205 = vmatmul.mubr.f32.gmra.mrb[24].mxu1 %v1530_v47  ;;  %v1475_v12 = vsel %vm1474_vm5, %v1472_v30, %v1469_v11  ;;  %v1507_v25 = vadd.f32 1.0, %v1506_v22  ;;  %vm1492_vm8 = vcmp.lt.f32.partialorder %v1491_v14, 0.0004427343  ;;  %vm1341_vm9 = vcmp.gt.f32.partialorder %v3661_v41, 20.0 }
 0x3ae   : > { %v1531_v19 = vsel %vm1339_vm4, %v3631_v2, %v1475_v12  ;;  %v1484_v15 = vsel %vm1483_vm7, %v1481_v48, %v1478_v5  ;;  %v1509_v2 = vand.u32 2147483647, %v3732_v27  ;;  %v1499_v8 = vmul.f32 %v3721_v58, %v1498_v17 }
 0x3af   : > { %v2610_v35 = vpop.eup %2609  ;;  %2207 = vmatprep.mubr.f32.mxu1 %v1531_v19  ;;  %v1532_v13 = vsel %vm1340_vm6, %v3626_v7, %v1484_v15  ;;  %v1516_v26 = vadd.f32 1.0, %v1515_v23  ;;  %vm1501_vm10 = vcmp.lt.f32.partialorder %v1500_v57, 0.0004427343  ;;  %v1508_v18 = vmul.f32 %v3732_v27, %v1507_v25 }
 0x3b0   : > { %v1487_v21 = vmul.f32 0.6931472, %v2610_v35  ;;  %v2612_v39 = vpop.eup %2611  ;;  %v1518_v56 = vand.u32 2147483647, %v3728_v1  ;;  %vm1342_vm11 = vcmp.gt.f32.partialorder %v3656_v59, 20.0  ;;  %vm1343_vm13 = vcmp.gt.f32.partialorder %v3680_v50, 20.0 }
 0x3b1   : > { %2208 = vmatmul.mubr.f32.gmra.mrb[26].mxu1 %v1532_v13  ;;  %v1496_v40 = vmul.f32 0.6931472, %v2612_v39  ;;  %vm1510_vm12 = vcmp.lt.f32.partialorder %v1509_v2, 0.0004427343  ;;  %v1517_v24 = vmul.f32 %v3728_v1, %v1516_v26  ;;  %vm1344_vm15 = vcmp.gt.f32.partialorder %v3673_v44, 20.0 }
 0x3b2   : > { %v1493_v36 = vsel %vm1492_vm8, %v1490_v63, %v1487_v21  ;;  %vm1519_vm14 = vcmp.lt.f32.partialorder %v1518_v56, 0.0004427343 }
 0x3b3   : > { %v1533_v34 = vsel %vm1341_vm9, %v3661_v41, %v1493_v36  ;;  %v1502_v52 = vsel %vm1501_vm10, %v1499_v8, %v1496_v40 }
 0x3b4   : > { %v2614_v10 = vpop.eup %2613  ;;  %2210 = vmatprep.mubr.f32.mxu1 %v1533_v34  ;;  %v1534_v9 = vsel %vm1342_vm11, %v3656_v59, %v1502_v52  ;;  %v1856_v59 = vld [vmem:[%s3852_s6] ss:$0 sm:$0xff] }
 0x3b5   : > { %v1505_v7 = vmul.f32 0.6931472, %v2614_v10  ;;  %v2616_v45 = vpop.eup %2615  ;;  %2211 = vmatmul.mubr.f32.gmra.mrb[28].mxu1 %v1534_v9 }
 0x3b6   : > { %v1514_v33 = vmul.f32 0.6931472, %v2616_v45 }
 0x3b7   : > { %v1511_v41 = vsel %vm1510_vm12, %v1508_v18, %v1505_v7 }
 0x3b8   : > { %v1535_v58 = vsel %vm1343_vm13, %v3680_v50, %v1511_v41  ;;  %v1520_v20 = vsel %vm1519_vm14, %v1517_v24, %v1514_v33 }
 0x3b9   : > { %2213 = vmatprep.mubr.f32.mxu1 %v1535_v58  ;;  %v1536_v43 = vsel %vm1344_vm15, %v3673_v44, %v1520_v20 }
 0x3ba   : > { %2214 = vmatmul.mubr.f32.gmra.mrb[30].mxu1 %v1536_v43 }
 0x463   : > { %v2194_v38 = vpop.f32.mrb[16].mxu1 }
 0x464   : > { %v1632_v49 = vadd.f32 %v2194_v38, %v1856_v59  ;;  %v1626_v4 = vpop.f32.mrb[17].mxu1 }
 0x465   : > { %v1627_v27 = vadd.f32 %v1856_v59, %v1626_v4 }
 0x466   : > { %1706 = vst [vmem:[%s3777_s21 + $0x8] sm:$0xff] %v1632_v49 }
 0x467   : > { %1705 = vst [vmem:[%s3777_s21] sm:$0xff] %v1627_v27 }
 0x469   : > { %v2197_v44 = vpop.f32.mrb[18].mxu1 }
 0x46a   : > { %v1642_v50 = vadd.f32 %v2197_v44, %v1856_v59  ;;  %v1636_v1 = vpop.f32.mrb[19].mxu1 }
 0x46b   : > { %v1637_v46 = vadd.f32 %v1856_v59, %v1636_v1 }
 0x46c   : > { %1708 = vst [vmem:[%s3777_s21 + $0x18] sm:$0xff] %v1642_v50 }
 0x46d   : > { %1707 = vst [vmem:[%s3777_s21 + $0x10] sm:$0xff] %v1637_v46 }
 0x472   : > { %v2200_v29 = vpop.f32.mrb[20].mxu1 }
 0x473   : > { %v1652_v0 = vadd.f32 %v2200_v29, %v1856_v59  ;;  %v1646_v54 = vpop.f32.mrb[21].mxu1 }
 0x474   : > { %v1647_v31 = vadd.f32 %v1856_v59, %v1646_v54 }
 0x475   : > { %1710 = vst [vmem:[%s3777_s21 + $0x28] sm:$0xff] %v1652_v0 }
 0x476   : > { %1709 = vst [vmem:[%s3777_s21 + $0x20] sm:$0xff] %v1647_v31 }
 0x478   : > { %v2203_v16 = vpop.f32.mrb[22].mxu1 }
 0x479   : > { %v1662_v61 = vadd.f32 %v2203_v16, %v1856_v59  ;;  %v1656_v62 = vpop.f32.mrb[23].mxu1 }
 0x47a   : > { %v1657_v53 = vadd.f32 %v1856_v59, %v1656_v62 }
 0x47b   : > { %1712 = vst [vmem:[%s3777_s21 + $0x38] sm:$0xff] %v1662_v61 }
 0x47c   : > { %1711 = vst [vmem:[%s3777_s21 + $0x30] sm:$0xff] %v1657_v53 }
 0x480   : > { %v2206_v42 = vpop.f32.mrb[24].mxu1 }
 0x481   : > { %v1672_v51 = vadd.f32 %v2206_v42, %v1856_v59  ;;  %v1666_v3 = vpop.f32.mrb[25].mxu1 }
 0x482   : > { %v1667_v32 = vadd.f32 %v1856_v59, %v1666_v3 }
 0x483   : > { %1714 = vst [vmem:[%s3777_s21 + $0x48] sm:$0xff] %v1672_v51 }
 0x484   : > { %1713 = vst [vmem:[%s3777_s21 + $0x40] sm:$0xff] %v1667_v32  ;;  %v2209_v6 = vpop.f32.mrb[26].mxu1 }
 0x485   : > { %v1682_v28 = vadd.f32 %v2209_v6, %v1856_v59  ;;  %v1676_v47 = vpop.f32.mrb[27].mxu1 }
 0x486   : > { %v1677_v11 = vadd.f32 %v1856_v59, %v1676_v47 }
 0x487   : > { %1716 = vst [vmem:[%s3777_s21 + $0x58] sm:$0xff] %v1682_v28 }
 0x488   : > { %1715 = vst [vmem:[%s3777_s21 + $0x50] sm:$0xff] %v1677_v11  ;;  %v2212_v30 = vpop.f32.mrb[28].mxu1 }
 0x489   : > { %v1692_v55 = vadd.f32 %v2212_v30, %v1856_v59  ;;  %v1686_v37 = vpop.f32.mrb[29].mxu1 }
 0x48a   : > { %v1687_v60 = vadd.f32 %v1856_v59, %v1686_v37 }
 0x48b   : > { %1718 = vst [vmem:[%s3777_s21 + $0x68] sm:$0xff] %v1692_v55 }
 0x48c   : > { %1717 = vst [vmem:[%s3777_s21 + $0x60] sm:$0xff] %v1687_v60 }
 0x48d   : > { %v2215_v22 = vpop.f32.mrb[30].mxu1 }
 0x48e   : > { %v1702_v12 = vadd.f32 %v2215_v22, %v1856_v59  ;;  %v1696_v5 = vpop.f32.mrb[31].mxu1 }
 0x48f   : > { %v1697_v48 = vadd.f32 %v1856_v59, %v1696_v5 }
 0x490   : > { %1720 = vst [vmem:[%s3777_s21 + $0x78] sm:$0xff] %v1702_v12 }
 0x491   : > { %1719 = vst [vmem:[%s3777_s21 + $0x70] sm:$0xff] %v1697_v48 }
 0x492   : > { %2744 = shalt.err (!%p2741_p4)
}
 0x493   : > { %s2745_s10 = scalar_lea.hbm %s3798_s8, 2048  ;;  %s2749_s20 = scalar_lea.hbm %s3853_s7, 4096 }
 0x494   : > { %p2746_p9 = scmp.ne.s32.totalorder %s3798_s8, %s2745_s10  ;;  %p2750_p8 = scmp.lt.u32.totalorder %s3798_s8, %s3853_s7 }
 0x495   : > { %p2751_p13 = scmp.lt.u32.totalorder %s2749_s20, %s2745_s10  ;;  %p2753_p10 = scmp.lt.u32.totalorder %s2745_s10, %s3798_s8 }
 0x496   : > { %p2747_p0 = pnand %p2746_p9, %p3010_p5 }
 0x497   : > { %p2752_p6 = por %p2751_p13, %p2750_p8 }
 0x498   : > { %p2748_p11 = pneg %p2747_p0 }
 0x499   : > { %p2754_p3 = por %p2753_p10, %p2752_p6 }
 0x49b   : > { %p2755_p7 = pnand %p2754_p3, %p2748_p11 }
 0x49d   : > { %2758 = shalt.err (!%p2755_p7)
}
 0x49e   : > { %s2814_s23 = smov 128   ;;  %s2815_s11 = smov 8  }
 0x49f   : > { %2358 = dma.vmem_to_hbm [thread:$0]  (%p3010_p5), %s3800_s29, 2048, %s3798_s8, %s1722_s28, %s2814_s23, %s2814_s23, %s2815_s11  }
 0x4a0 PF: > { %s3901_s30 = sld [smem:[#allocation15_spill]]  ;;  %s1750_s9 = sand.u32 1, %s2793_s24  }
 0x4a1   : > { %p3903_p1 = scmp.ge.s32.totalorder %s2805_s27, 2  ;;  %s1751_s13 = scalar_lea.sflag [#allocation4], %s1750_s9 }
 0x4a6   : > { %p3902_p12 = scmp.ne.s32.totalorder %s3901_s30, 0 }
 0x4a8   : > { %p2375_p2 = pnand %p3903_p1, %p3902_p12 }
 0x4aa   : > { %2788 = dma.done.wait (!%p2375_p2), %s1751_s13, 2048  }
 0x4ab   : > { %2790 = vsyncadd (!%p2375_p2), %s1751_s13, 4294965248  ;;  %p22_p4 = scmp.ge.s32.totalorder %s2996_s22, 4   ;;  %s3904_s24 = smov %s2797_s25 }
 0x4ac   : > { %s3905_s25 = smov %s2801_s26  ;;  %s3906_s26 = smov %s3006_s18 }
 0x4ad   : > { %s3907_s27 = smov %s2996_s22  ;;  %24 = sbr.rel (!%p22_p4) target bundleno = 7 (0x7), region = 107 }
 0x4b4   :  { %1756 = vsyncpa [#allocation3], 1 }
 0x4b5   :  { %1758 = vsyncpa [#allocation3 + $0x1], 1 }
 0x4b6   :  { %1759 = vsyncpa [#allocation6], 1 }
 0x4b7   :  { %1760 = vsyncpa [#allocation9], 1 }
 0x4b8   :  { %1761 = vsyncpa [#allocation4], 1 }
 0x4b9   :  { %1763 = vsyncpa [#allocation4 + $0x1], 1 }

</bundles_post_ra>
